<compile_context>
chip_gen: v5e
topology: v5e:2x2
jax: 0.10.0
libtpu: 0.0.40
codegen_flags: <defaults>
</compile_context>

<pallas_src>
import jax
import jax.numpy as jnp
from jax.experimental import pallas as pl
from jax.experimental.pallas import tpu as pltpu

RNN_LAYERS = 5
INPUT_SIZE = 9 + 6 + 6           # 21
TOPOLOGY = (32, 32)
OUT_SIZE = 6
DIAG_ROWS = 8                    # recurrence anti-diagonal held as one [8, Kb] sublane-aligned slab
K_BLOCK_MAX = 2048               # lanes per grid block; sweep per generation (v5e~1024, v6e~2048, v7x 2048-4096)


def _rot_planes(qx, qy, qz, qw):
    """Rotation-matrix entries (row-major) as planes, from a unit quaternion (xyzw)."""
    xx = qx * qx; yy = qy * qy; zz = qz * qz
    xy = qx * qy; xz = qx * qz; yz = qy * qz
    wx = qw * qx; wy = qw * qy; wz = qw * qz
    r00 = 1.0 - 2.0 * (yy + zz); r01 = 2.0 * (xy - wz);       r02 = 2.0 * (xz + wy)
    r10 = 2.0 * (xy + wz);       r11 = 1.0 - 2.0 * (xx + zz); r12 = 2.0 * (yz - wx)
    r20 = 2.0 * (xz - wy);       r21 = 2.0 * (yz + wx);       r22 = 1.0 - 2.0 * (xx + yy)
    return r00, r01, r02, r10, r11, r12, r20, r21, r22


def _leaky(x):
    return jnp.where(x >= 0, x, 0.1 * x)


def _cross(ax, ay, az, bx, by, bz):
    return (ay * bz - az * by, az * bx - ax * bz, ax * by - ay * bx)


def _auv_step_kernel(dt_ref, w_ih0_ref,                                  # SMEM scalars
                     x_ref, v_ref, a_ref, h0_ref,                        # VMEM, K-blocked
                     w_hh_col_ref, w_ih_col_ref,                         # VMEM [8,1] RNN weights
                     fc1_w_ref, fc1_b_ref, w2f_ref, fc2_b_ref, w3_ref,   # VMEM FC weights
                     xn_ref, vn_ref, dv_ref, hn_ref,                     # outputs
                     pre_in_ref, out0_ref):                              # VMEM scratch
    L = RNN_LAYERS
    S = x_ref.shape[1]
    Kb = x_ref.shape[2]

    # ---------------- RNN layer-0 input projection for ALL timesteps (off the serial chain) -------
    # pre_in[t, k] = sum_i w_ih0[i] * feat_i[t, k]  -- pure VPU FMAs, weights from SMEM.
    qx = x_ref[3]; qy = x_ref[4]; qz = x_ref[5]; qw = x_ref[6]
    feats = list(_rot_planes(qx, qy, qz, qw)) \
        + [v_ref[i] for i in range(6)] + [a_ref[i] for i in range(6)]    # 21 x [S, Kb]
    parts = []                                                           # 4-way tree reduction (ILP)
    for c in range(0, INPUT_SIZE, 6):
        p = feats[c] * w_ih0_ref[c]
        for j in range(c + 1, min(c + 6, INPUT_SIZE)):
            p = p + feats[j] * w_ih0_ref[j]
        parts.append(p)
    pre_in = parts[0]
    for p in parts[1:]:
        pre_in = pre_in + p
    pre_in_ref[...] = pre_in       # stage in VMEM; one row re-loaded per diagonal (kills vreg pressure)

    # ---------------- 5-layer tanh recurrence on whole anti-diagonals ----------------
    # diag[l] = H[l][d - l]; rows with d-l < 0 hold h0[l]; rows past the sequence end are dead.
    # One pltpu.roll (XLU) + 2 broadcast muls + 1 tanh per diagonal; L+S-1 diagonals total.
    w_hh_col = w_hh_col_ref[...]                                         # [8, 1]
    w_ih_col = w_ih_col_ref[...]                                         # [8, 1] (row 0 patched below)
    rows = jax.lax.broadcasted_iota(jnp.int32, (DIAG_ROWS, 1), 0)
    row0 = rows == 0
    prev = h0_ref[...]                                                   # [8, Kb] (rows L..7 zero pad)
    for d in range(L + S - 1):                                           # static unrolled loop
        rolled = pltpu.roll(prev, 1, axis=0)                             # rolled[l] = prev[l-1]
        in_term = w_ih_col * rolled
        if d <= S - 1:                                                   # layer-0 cell active here
            in_term = jnp.where(row0, pre_in_ref[d:d + 1, :], in_term)
        new = jnp.tanh(in_term + w_hh_col * prev)                        # ONE tanh per diagonal
        if d < L - 1:                                                    # startup: untouched layers keep h0
            new = jnp.where(rows <= d, new, prev)
        if d == L - 1:                                                   # H[last layer][t=0] == out[:, 0]
            out0_ref[...] = new[L - 1:L, :]
        lf = d - (S - 1)
        if 0 <= lf < L:                                                  # layer lf finished -> store hN row now
            hn_ref[lf:lf + 1, :] = new[lf:lf + 1, :]
        prev = new

    # ---------------- FC head (BatchNorm folded to scale/shift, eval mode) -- on the idle MXU ------
    # TODO(synk): training-mode BatchNorm (per-batch statistics) not implemented.
    out0 = out0_ref[...]                                                 # [1, Kb]
    f1 = _leaky(fc1_w_ref[...] * out0 + fc1_b_ref[...])                  # [32, Kb]
    f2 = _leaky(jnp.dot(w2f_ref[...], f1, preferred_element_type=jnp.float32)
                + fc2_b_ref[...])                                        # [32, Kb]
    dv = jnp.dot(w3_ref[...], f2, preferred_element_type=jnp.float32)    # [6, Kb]
    dv_ref[...] = dv

    # ---------------- t = Exp(se3(v * dt)); x_next = x * t  (v_frame == 'body') ----------------
    dt = dt_ref[0]
    rho_x = v_ref[0] * dt; rho_y = v_ref[1] * dt; rho_z = v_ref[2] * dt
    phi_x = v_ref[3] * dt; phi_y = v_ref[4] * dt; phi_z = v_ref[5] * dt
    theta2 = phi_x * phi_x + phi_y * phi_y + phi_z * phi_z
    theta = jnp.sqrt(theta2)
    small = theta < 1e-6
    theta_safe = jnp.where(small, 1.0, theta)
    theta2_safe = jnp.where(small, 1.0, theta2)
    half = 0.5 * theta

    sinc_half = jnp.where(small, 0.5 - theta2 / 48.0, jnp.sin(half) / theta_safe)
    qv_x = phi_x * sinc_half; qv_y = phi_y * sinc_half; qv_z = phi_z * sinc_half
    q2w = jnp.cos(half)

    c1 = jnp.where(small, 0.5 - theta2 / 24.0, (1.0 - jnp.cos(theta)) / theta2_safe)
    c2 = jnp.where(small, 1.0 / 6.0 - theta2 / 120.0,
                   (theta - jnp.sin(theta)) / (theta2_safe * theta_safe))
    cx1, cy1, cz1 = _cross(phi_x, phi_y, phi_z, rho_x, rho_y, rho_z)
    cx2, cy2, cz2 = _cross(phi_x, phi_y, phi_z, cx1, cy1, cz1)
    t_x = rho_x + c1 * cx1 + c2 * cx2
    t_y = rho_y + c1 * cy1 + c2 * cy2
    t_z = rho_z + c1 * cz1 + c2 * cz2

    # translation of x*t = p1 + R(q1) @ t_trans.  Quaternion re-loaded here (fresh vlds) so the
    # planes are NOT held live across the recurrence / FC head -- bounds vreg live ranges.
    qx = x_ref[3]; qy = x_ref[4]; qz = x_ref[5]; qw = x_ref[6]
    r00, r01, r02, r10, r11, r12, r20, r21, r22 = _rot_planes(qx, qy, qz, qw)
    xn_ref[0] = x_ref[0] + r00 * t_x + r01 * t_y + r02 * t_z
    xn_ref[1] = x_ref[1] + r10 * t_x + r11 * t_y + r12 * t_z
    xn_ref[2] = x_ref[2] + r20 * t_x + r21 * t_y + r22 * t_z

    # quaternion product q1 (x) q2  (xyzw convention)
    xn_ref[3] = qw * qv_x + qx * q2w + qy * qv_z - qz * qv_y
    xn_ref[4] = qw * qv_y - qx * qv_z + qy * q2w + qz * qv_x
    xn_ref[5] = qw * qv_z + qx * qv_y - qy * qv_x + qz * q2w
    xn_ref[6] = qw * q2w - qx * qv_x - qy * qv_y - qz * qv_z

    # v_frame == dv_frame == 'body'  =>  v_next = v + dv (dv broadcast over seq dim)
    for i in range(OUT_SIZE):
        vn_ref[i] = v_ref[i] + dv[i:i + 1, :]


def make_params(key):
    """Random parameters matching the default AUVRNNDeltaV init, pre-folded for the kernel."""
    ks = jax.random.split(key, 10)
    L, I = RNN_LAYERS, INPUT_SIZE
    inv32 = 32.0 ** -0.5
    # RNN weights (PyTorch default U(-1/sqrt(H), 1/sqrt(H)) with H = 1).
    w_ih0 = jax.random.uniform(ks[0], (I,), jnp.float32, -1.0, 1.0)          # layer-0 W_ih
    w_hh = jax.random.uniform(ks[1], (L,), jnp.float32, -1.0, 1.0)           # per-layer W_hh
    w_ih_rest = jax.random.uniform(ks[2], (L,), jnp.float32, -1.0, 1.0)      # per-layer W_ih (l >= 1)
    w_hh_col = jnp.zeros((DIAG_ROWS, 1), jnp.float32).at[:L, 0].set(w_hh)
    w_ih_col = jnp.zeros((DIAG_ROWS, 1), jnp.float32).at[1:L, 0].set(w_ih_rest[1:])
    # FC weights.
    w1 = jax.random.uniform(ks[3], (TOPOLOGY[0],), jnp.float32, -1.0, 1.0)   # Linear(1, 32)
    w2 = jax.random.uniform(ks[4], (TOPOLOGY[1], TOPOLOGY[0]), jnp.float32, -inv32, inv32)
    w3 = jax.random.uniform(ks[5], (OUT_SIZE, TOPOLOGY[1]), jnp.float32, -inv32, inv32)

    def bn_fold(kg, kb, n):                                                  # eval-mode fold
        gamma = 1.0 + 0.1 * jax.random.normal(kg, (n,), jnp.float32)
        beta = 0.1 * jax.random.normal(kb, (n,), jnp.float32)
        mean = jnp.zeros((n,), jnp.float32)
        var = jnp.ones((n,), jnp.float32)
        scale = gamma / jnp.sqrt(var + 1e-5)
        return scale, beta - mean * scale

    s1, b1 = bn_fold(ks[6], ks[7], TOPOLOGY[0])
    s2, b2 = bn_fold(ks[8], ks[9], TOPOLOGY[1])
    return dict(
        w_ih0=w_ih0,                     # [21]     -> SMEM
        w_hh_col=w_hh_col,               # [8, 1]   -> VMEM (rows L..7 zero)
        w_ih_col=w_ih_col,               # [8, 1]   -> VMEM (rows 0, L..7 zero)
        fc1_w=(s1 * w1)[:, None],        # [32, 1]  bn1 folded into Linear(1,32)
        fc1_b=b1[:, None],               # [32, 1]
        w2f=s2[:, None] * w2,            # [32, 32] bn2 folded into Linear(32,32)
        fc2_b=b2[:, None],               # [32, 1]
        w3=w3,                           # [6, 32]
    )


def _round_up(x, m):
    return (x + m - 1) // m * m


def _block_k(kp):
    """Lane-block over the (128-padded) batch dim.  Guarantees >= 2 grid blocks whenever
    possible so the 'parallel' axis shards across both v7x TensorCores."""
    n = kp // 128
    if n <= 1:
        return 128
    groups = min(K_BLOCK_MAX // 128, (n + 1) // 2)
    return groups * 128


def auv_step_fsk(params, x_f, v_f, a_f, h0_lk, dt):
    """Feature-major hot path (no layout transposes).
    x_f: [7,S,K], v_f/a_f: [6,S,K], h0_lk: [L,K], dt: scalar.
    Returns x_next [7,S,K], v_next [6,S,K], dv [6,K], h_next [L,K]."""
    _, S, K = x_f.shape
    Kp = _round_up(K, 128)                         # pad batch to full lanes (no OOB tail lanes)
    if Kp != K:
        lane_pad = [(0, 0), (0, 0), (0, Kp - K)]
        x_f = jnp.pad(x_f, lane_pad)
        v_f = jnp.pad(v_f, lane_pad)
        a_f = jnp.pad(a_f, lane_pad)
    h0_p = jnp.pad(h0_lk.astype(jnp.float32),
                   [(0, DIAG_ROWS - RNN_LAYERS), (0, Kp - K)])            # [8, Kp], rows L..7 zero
    Kb = _block_k(Kp)
    grid = (pl.cdiv(Kp, Kb),)
    dt_arr = jnp.full((1,), dt, jnp.float32)

    smem = pl.BlockSpec(memory_space=pltpu.MemorySpace.SMEM)
    vmem = pl.BlockSpec(memory_space=pltpu.MemorySpace.VMEM)
    blk3 = lambda f: pl.BlockSpec((f, S, Kb), lambda i: (0, 0, i))
    blk2 = lambda f: pl.BlockSpec((f, Kb), lambda i: (0, i))

    out_shape = (
        jax.ShapeDtypeStruct((7, S, Kp), jnp.float32),
        jax.ShapeDtypeStruct((6, S, Kp), jnp.float32),
        jax.ShapeDtypeStruct((OUT_SIZE, Kp), jnp.float32),
        jax.ShapeDtypeStruct((DIAG_ROWS, Kp), jnp.float32),
    )
    xn, vn, dv, hn = pl.pallas_call(
        _auv_step_kernel,
        grid=grid,
        out_shape=out_shape,
        in_specs=[smem, smem,
                  blk3(7), blk3(6), blk3(6), blk2(DIAG_ROWS),
                  vmem, vmem,
                  vmem, vmem, vmem, vmem, vmem],
        out_specs=(blk3(7), blk3(6), blk2(OUT_SIZE), blk2(DIAG_ROWS)),
        scratch_shapes=[pltpu.VMEM((S, Kb), jnp.float32),    # staged pre_in rows
                        pltpu.VMEM((1, Kb), jnp.float32)],   # out[:, 0] parked across the recurrence
        # x -> x_next, v -> v_next, h0 -> h_next reuse the same HBM buffers (identical block maps).
        input_output_aliases={2: 0, 3: 1, 5: 3},
        compiler_params=pltpu.CompilerParams(
            dimension_semantics=("parallel",)),
    )(dt_arr, params["w_ih0"],
      x_f, v_f, a_f, h0_p,
      params["w_hh_col"], params["w_ih_col"],
      params["fc1_w"], params["fc1_b"], params["w2f"], params["fc2_b"], params["w3"])
    if Kp != K:
        xn = xn[..., :K]; vn = vn[..., :K]; dv = dv[..., :K]
    return xn, vn, dv, hn[:RNN_LAYERS, :K]


def auv_step(params, x, v, a, h0=None, dt=0.1):
    """Batch-first (PyTorch-style) adaptor.
    x: [K,S,7] (pypose SE3: t, q_xyzw), v,a: [K,S,6], h0: [L,K,1] or None.
    Returns (x_next [K,S,7], v_next [K,S,6], dv [K,1,6], h_next [L,K,1]).
    NOTE: memory-bound callers should use auv_step_fsk() directly with feature-major
    data and skip these transpose round trips (they cost more HBM than the kernel)."""
    K, S, _ = x.shape
    if h0 is None:
        h0_lk = jnp.zeros((RNN_LAYERS, K), jnp.float32)
    else:
        h0_lk = h0[..., 0].astype(jnp.float32)
    x_f = jnp.transpose(x, (2, 1, 0)).astype(jnp.float32)
    v_f = jnp.transpose(v, (2, 1, 0)).astype(jnp.float32)
    a_f = jnp.transpose(a, (2, 1, 0)).astype(jnp.float32)
    xn_f, vn_f, dv, hn = auv_step_fsk(params, x_f, v_f, a_f, h0_lk, dt)
    x_next = jnp.transpose(xn_f, (2, 1, 0))
    v_next = jnp.transpose(vn_f, (2, 1, 0))
    return x_next, v_next, dv.T[:, None, :], hn[..., None]


def _reference(params, x, v, a, h0_lk, dt):
    """Pure-jnp mirror of the module (batch-first), used only for the self-check."""
    K, S, _ = x.shape
    qx, qy, qz, qw = (x[..., i] for i in range(3, 7))                 # each [K,S]
    r = _rot_planes(qx, qy, qz, qw)
    feats = jnp.stack(list(r) + [v[..., i] for i in range(6)]
                      + [a[..., i] for i in range(6)], axis=-1)       # [K,S,21]
    pre_in = feats @ params["w_ih0"]                                  # [K,S]
    L = RNN_LAYERS
    w_hh = params["w_hh_col"][:L, 0]
    w_ih = params["w_ih_col"][:L, 0]
    h = [h0_lk[l] for l in range(L)]
    out0 = None
    for t in range(S):
        nh = [jnp.tanh(pre_in[:, t] + w_hh[0] * h[0])]
        for l in range(1, L):
            nh.append(jnp.tanh(w_ih[l] * nh[l - 1] + w_hh[l] * h[l]))
        h = nh
        if t == 0:
            out0 = h[-1]                                              # [K]
    hN = jnp.stack(h, axis=0)                                         # [L,K]

    f1 = out0[:, None] * params["fc1_w"][:, 0][None, :] + params["fc1_b"][:, 0][None, :]
    f1 = jnp.where(f1 >= 0, f1, 0.1 * f1)
    f2 = f1 @ params["w2f"].T + params["fc2_b"][:, 0][None, :]
    f2 = jnp.where(f2 >= 0, f2, 0.1 * f2)
    dv = f2 @ params["w3"].T                                          # [K,6]

    tau = v * dt
    rho = tau[..., 0:3]; phi = tau[..., 3:6]
    theta2 = jnp.sum(phi * phi, axis=-1)
    theta = jnp.sqrt(theta2)
    small = theta < 1e-6
    theta_s = jnp.where(small, 1.0, theta)
    theta2_s = jnp.where(small, 1.0, theta2)
    half = 0.5 * theta
    sinc_half = jnp.where(small, 0.5 - theta2 / 48.0, jnp.sin(half) / theta_s)
    qv = phi * sinc_half[..., None]
    q2w = jnp.cos(half)
    c1 = jnp.where(small, 0.5 - theta2 / 24.0, (1.0 - jnp.cos(theta)) / theta2_s)
    c2 = jnp.where(small, 1.0 / 6.0 - theta2 / 120.0, (theta - jnp.sin(theta)) / (theta2_s * theta_s))
    cr1 = jnp.cross(phi, rho)
    cr2 = jnp.cross(phi, cr1)
    t_tr = rho + c1[..., None] * cr1 + c2[..., None] * cr2
    R = jnp.stack([jnp.stack(r[0:3], axis=-1),
                   jnp.stack(r[3:6], axis=-1),
                   jnp.stack(r[6:9], axis=-1)], axis=-2)              # [K,S,3,3]
    p_next = x[..., 0:3] + jnp.einsum("ksij,ksj->ksi", R, t_tr)
    q2x, q2y, q2z = qv[..., 0], qv[..., 1], qv[..., 2]
    qnx = qw * q2x + qx * q2w + qy * q2z - qz * q2y
    qny = qw * q2y - qx * q2z + qy * q2w + qz * q2x
    qnz = qw * q2z + qx * q2y - qy * q2x + qz * q2w
    qnw = qw * q2w - qx * q2x - qy * q2y - qz * q2z
    x_next = jnp.concatenate([p_next, jnp.stack([qnx, qny, qnz, qnw], axis=-1)], axis=-1)
    v_next = v + dv[:, None, :]
    return x_next, v_next, dv[:, None, :], hN[..., None]


if __name__ == "__main__":
    key = jax.random.PRNGKey(0)
    kp, kx, kq, kv, ka = jax.random.split(key, 5)
    params = make_params(kp)

    K, S = 4, 8                                   # batch of 4 trajectories, 8 time steps
    trans = 0.5 * jax.random.normal(kx, (K, S, 3), jnp.float32)
    quat = jax.random.normal(kq, (K, S, 4), jnp.float32)
    quat = quat / jnp.linalg.norm(quat, axis=-1, keepdims=True)
    x = jnp.concatenate([trans, quat], axis=-1)   # [K, S, 7] pypose SE3 (t, q_xyzw)
    v = 0.3 * jax.random.normal(kv, (K, S, 6), jnp.float32)
    a = 0.3 * jax.random.normal(ka, (K, S, 6), jnp.float32)

    x_next, v_next, dv, h_next = auv_step(params, x, v, a, h0=None, dt=0.1)
    jax.block_until_ready((x_next, v_next, dv, h_next))

    assert x_next.shape == (K, S, 7)
    assert v_next.shape == (K, S, 6)
    assert dv.shape == (K, 1, 6)
    assert h_next.shape == (RNN_LAYERS, K, 1)

    # numerical self-check against a pure-JAX mirror of the module
    xr, vr, dvr, hr = _reference(params, x, v, a, jnp.zeros((RNN_LAYERS, K), jnp.float32), 0.1)
    assert jnp.allclose(x_next, xr, atol=2e-3, rtol=2e-3)
    assert jnp.allclose(v_next, vr, atol=2e-3, rtol=2e-3)
    assert jnp.allclose(dv, dvr, atol=2e-3, rtol=2e-3)
    assert jnp.allclose(h_next, hr, atol=2e-3, rtol=2e-3)

    print("KERNEL_OK")
</pallas_src>

<mosaic_0001>
module attributes {stable_mosaic.version = 11 : i64} {
  func.func @_auv_step_kernel(%arg0: i32, %arg1: memref<1xf32, #tpu.memory_space<smem>>, %arg2: memref<21xf32, #tpu.memory_space<smem>>, %arg3: memref<7x8x128xf32, #tpu.memory_space<vmem>>, %arg4: memref<6x8x128xf32, #tpu.memory_space<vmem>>, %arg5: memref<6x8x128xf32, #tpu.memory_space<vmem>>, %arg6: memref<8x128xf32, #tpu.memory_space<vmem>>, %arg7: memref<8x1xf32, #tpu.memory_space<vmem>>, %arg8: memref<8x1xf32, #tpu.memory_space<vmem>>, %arg9: memref<32x1xf32, #tpu.memory_space<vmem>>, %arg10: memref<32x1xf32, #tpu.memory_space<vmem>>, %arg11: memref<32x32xf32, #tpu.memory_space<vmem>>, %arg12: memref<32x1xf32, #tpu.memory_space<vmem>>, %arg13: memref<6x32xf32, #tpu.memory_space<vmem>>, %arg14: memref<7x8x128xf32, #tpu.memory_space<vmem>>, %arg15: memref<6x8x128xf32, #tpu.memory_space<vmem>>, %arg16: memref<6x128xf32, #tpu.memory_space<vmem>>, %arg17: memref<8x128xf32, #tpu.memory_space<vmem>>, %arg18: memref<8x128xf32, #tpu.memory_space<vmem>>, %arg19: memref<1x128xf32, #tpu.memory_space<vmem>>) attributes {dimension_semantics = [#tpu.dimension_semantics<parallel>], iteration_bounds = array<i64: 1>, scalar_prefetch = 0 : i64, scratch_operands = 2 : i64, tpu.core_type = #tpu.core_type<tc>, window_params = [{transform_indices = @transform_0, window_bounds = array<i64: 1>}, {transform_indices = @transform_1, window_bounds = array<i64: 21>}, {transform_indices = @transform_2, window_bounds = array<i64: 7, 8, 128>}, {transform_indices = @transform_3, window_bounds = array<i64: 6, 8, 128>}, {transform_indices = @transform_4, window_bounds = array<i64: 6, 8, 128>}, {transform_indices = @transform_5, window_bounds = array<i64: 8, 128>}, {pipeline_mode = #tpu.pipeline_mode<synchronous>, transform_indices = @transform_6, window_bounds = array<i64: 8, 1>}, {pipeline_mode = #tpu.pipeline_mode<synchronous>, transform_indices = @transform_7, window_bounds = array<i64: 8, 1>}, {pipeline_mode = #tpu.pipeline_mode<synchronous>, transform_indices = @transform_8, window_bounds = array<i64: 32, 1>}, {pipeline_mode = #tpu.pipeline_mode<synchronous>, transform_indices = @transform_9, window_bounds = array<i64: 32, 1>}, {pipeline_mode = #tpu.pipeline_mode<synchronous>, transform_indices = @transform_10, window_bounds = array<i64: 32, 32>}, {pipeline_mode = #tpu.pipeline_mode<synchronous>, transform_indices = @transform_11, window_bounds = array<i64: 32, 1>}, {pipeline_mode = #tpu.pipeline_mode<synchronous>, transform_indices = @transform_12, window_bounds = array<i64: 6, 32>}, {transform_indices = @transform_13, window_bounds = array<i64: 7, 8, 128>}, {transform_indices = @transform_14, window_bounds = array<i64: 6, 8, 128>}, {transform_indices = @transform_15, window_bounds = array<i64: 6, 128>}, {transform_indices = @transform_16, window_bounds = array<i64: 8, 128>}]} {
    %c3 = arith.constant 3 : index
    %c0 = arith.constant 0 : index
    %c0_0 = arith.constant 0 : index
    %0 = vector.load %arg3[%c3, %c0, %c0_0] : memref<7x8x128xf32, #tpu.memory_space<vmem>>, vector<1x8x128xf32>
    %1 = vector.shape_cast %0 : vector<1x8x128xf32> to vector<8x128xf32>
    %c4 = arith.constant 4 : index
    %c0_1 = arith.constant 0 : index
    %c0_2 = arith.constant 0 : index
    %2 = vector.load %arg3[%c4, %c0_1, %c0_2] : memref<7x8x128xf32, #tpu.memory_space<vmem>>, vector<1x8x128xf32>
    %3 = vector.shape_cast %2 : vector<1x8x128xf32> to vector<8x128xf32>
    %c5 = arith.constant 5 : index
    %c0_3 = arith.constant 0 : index
    %c0_4 = arith.constant 0 : index
    %4 = vector.load %arg3[%c5, %c0_3, %c0_4] : memref<7x8x128xf32, #tpu.memory_space<vmem>>, vector<1x8x128xf32>
    %5 = vector.shape_cast %4 : vector<1x8x128xf32> to vector<8x128xf32>
    %c6 = arith.constant 6 : index
    %c0_5 = arith.constant 0 : index
    %c0_6 = arith.constant 0 : index
    %6 = vector.load %arg3[%c6, %c0_5, %c0_6] : memref<7x8x128xf32, #tpu.memory_space<vmem>>, vector<1x8x128xf32>
    %7 = vector.shape_cast %6 : vector<1x8x128xf32> to vector<8x128xf32>
    %8 = arith.mulf %1, %1 : vector<8x128xf32>
    %9 = arith.mulf %3, %3 : vector<8x128xf32>
    %10 = arith.mulf %5, %5 : vector<8x128xf32>
    %11 = arith.mulf %1, %3 : vector<8x128xf32>
    %12 = arith.mulf %1, %5 : vector<8x128xf32>
    %13 = arith.mulf %3, %5 : vector<8x128xf32>
    %14 = arith.mulf %7, %1 : vector<8x128xf32>
    %15 = arith.mulf %7, %3 : vector<8x128xf32>
    %16 = arith.mulf %7, %5 : vector<8x128xf32>
    %17 = arith.addf %9, %10 : vector<8x128xf32>
    %cst = arith.constant 2.000000e+00 : f32
    %18 = vector.broadcast %cst : f32 to vector<8x128xf32>
    %19 = arith.mulf %18, %17 : vector<8x128xf32>
    %cst_7 = arith.constant 1.000000e+00 : f32
    %20 = vector.broadcast %cst_7 : f32 to vector<8x128xf32>
    %21 = arith.subf %20, %19 : vector<8x128xf32>
    %22 = arith.subf %11, %16 : vector<8x128xf32>
    %cst_8 = arith.constant 2.000000e+00 : f32
    %23 = vector.broadcast %cst_8 : f32 to vector<8x128xf32>
    %24 = arith.mulf %23, %22 : vector<8x128xf32>
    %25 = arith.addf %12, %15 : vector<8x128xf32>
    %cst_9 = arith.constant 2.000000e+00 : f32
    %26 = vector.broadcast %cst_9 : f32 to vector<8x128xf32>
    %27 = arith.mulf %26, %25 : vector<8x128xf32>
    %28 = arith.addf %11, %16 : vector<8x128xf32>
    %cst_10 = arith.constant 2.000000e+00 : f32
    %29 = vector.broadcast %cst_10 : f32 to vector<8x128xf32>
    %30 = arith.mulf %29, %28 : vector<8x128xf32>
    %31 = arith.addf %8, %10 : vector<8x128xf32>
    %cst_11 = arith.constant 2.000000e+00 : f32
    %32 = vector.broadcast %cst_11 : f32 to vector<8x128xf32>
    %33 = arith.mulf %32, %31 : vector<8x128xf32>
    %cst_12 = arith.constant 1.000000e+00 : f32
    %34 = vector.broadcast %cst_12 : f32 to vector<8x128xf32>
    %35 = arith.subf %34, %33 : vector<8x128xf32>
    %36 = arith.subf %13, %14 : vector<8x128xf32>
    %cst_13 = arith.constant 2.000000e+00 : f32
    %37 = vector.broadcast %cst_13 : f32 to vector<8x128xf32>
    %38 = arith.mulf %37, %36 : vector<8x128xf32>
    %39 = arith.subf %12, %15 : vector<8x128xf32>
    %cst_14 = arith.constant 2.000000e+00 : f32
    %40 = vector.broadcast %cst_14 : f32 to vector<8x128xf32>
    %41 = arith.mulf %40, %39 : vector<8x128xf32>
    %42 = arith.addf %13, %14 : vector<8x128xf32>
    %cst_15 = arith.constant 2.000000e+00 : f32
    %43 = vector.broadcast %cst_15 : f32 to vector<8x128xf32>
    %44 = arith.mulf %43, %42 : vector<8x128xf32>
    %45 = arith.addf %8, %9 : vector<8x128xf32>
    %cst_16 = arith.constant 2.000000e+00 : f32
    %46 = vector.broadcast %cst_16 : f32 to vector<8x128xf32>
    %47 = arith.mulf %46, %45 : vector<8x128xf32>
    %cst_17 = arith.constant 1.000000e+00 : f32
    %48 = vector.broadcast %cst_17 : f32 to vector<8x128xf32>
    %49 = arith.subf %48, %47 : vector<8x128xf32>
    %c0_18 = arith.constant 0 : index
    %c0_19 = arith.constant 0 : index
    %c0_20 = arith.constant 0 : index
    %50 = vector.load %arg4[%c0_18, %c0_19, %c0_20] : memref<6x8x128xf32, #tpu.memory_space<vmem>>, vector<1x8x128xf32>
    %51 = vector.shape_cast %50 : vector<1x8x128xf32> to vector<8x128xf32>
    %c1 = arith.constant 1 : index
    %c0_21 = arith.constant 0 : index
    %c0_22 = arith.constant 0 : index
    %52 = vector.load %arg4[%c1, %c0_21, %c0_22] : memref<6x8x128xf32, #tpu.memory_space<vmem>>, vector<1x8x128xf32>
    %53 = vector.shape_cast %52 : vector<1x8x128xf32> to vector<8x128xf32>
    %c2 = arith.constant 2 : index
    %c0_23 = arith.constant 0 : index
    %c0_24 = arith.constant 0 : index
    %54 = vector.load %arg4[%c2, %c0_23, %c0_24] : memref<6x8x128xf32, #tpu.memory_space<vmem>>, vector<1x8x128xf32>
    %55 = vector.shape_cast %54 : vector<1x8x128xf32> to vector<8x128xf32>
    %c3_25 = arith.constant 3 : index
    %c0_26 = arith.constant 0 : index
    %c0_27 = arith.constant 0 : index
    %56 = vector.load %arg4[%c3_25, %c0_26, %c0_27] : memref<6x8x128xf32, #tpu.memory_space<vmem>>, vector<1x8x128xf32>
    %57 = vector.shape_cast %56 : vector<1x8x128xf32> to vector<8x128xf32>
    %c4_28 = arith.constant 4 : index
    %c0_29 = arith.constant 0 : index
    %c0_30 = arith.constant 0 : index
    %58 = vector.load %arg4[%c4_28, %c0_29, %c0_30] : memref<6x8x128xf32, #tpu.memory_space<vmem>>, vector<1x8x128xf32>
    %59 = vector.shape_cast %58 : vector<1x8x128xf32> to vector<8x128xf32>
    %c5_31 = arith.constant 5 : index
    %c0_32 = arith.constant 0 : index
    %c0_33 = arith.constant 0 : index
    %60 = vector.load %arg4[%c5_31, %c0_32, %c0_33] : memref<6x8x128xf32, #tpu.memory_space<vmem>>, vector<1x8x128xf32>
    %61 = vector.shape_cast %60 : vector<1x8x128xf32> to vector<8x128xf32>
    %c0_34 = arith.constant 0 : index
    %c0_35 = arith.constant 0 : index
    %c0_36 = arith.constant 0 : index
    %62 = vector.load %arg5[%c0_34, %c0_35, %c0_36] : memref<6x8x128xf32, #tpu.memory_space<vmem>>, vector<1x8x128xf32>
    %63 = vector.shape_cast %62 : vector<1x8x128xf32> to vector<8x128xf32>
    %c1_37 = arith.constant 1 : index
    %c0_38 = arith.constant 0 : index
    %c0_39 = arith.constant 0 : index
    %64 = vector.load %arg5[%c1_37, %c0_38, %c0_39] : memref<6x8x128xf32, #tpu.memory_space<vmem>>, vector<1x8x128xf32>
    %65 = vector.shape_cast %64 : vector<1x8x128xf32> to vector<8x128xf32>
    %c2_40 = arith.constant 2 : index
    %c0_41 = arith.constant 0 : index
    %c0_42 = arith.constant 0 : index
    %66 = vector.load %arg5[%c2_40, %c0_41, %c0_42] : memref<6x8x128xf32, #tpu.memory_space<vmem>>, vector<1x8x128xf32>
    %67 = vector.shape_cast %66 : vector<1x8x128xf32> to vector<8x128xf32>
    %c3_43 = arith.constant 3 : index
    %c0_44 = arith.constant 0 : index
    %c0_45 = arith.constant 0 : index
    %68 = vector.load %arg5[%c3_43, %c0_44, %c0_45] : memref<6x8x128xf32, #tpu.memory_space<vmem>>, vector<1x8x128xf32>
    %69 = vector.shape_cast %68 : vector<1x8x128xf32> to vector<8x128xf32>
    %c4_46 = arith.constant 4 : index
    %c0_47 = arith.constant 0 : index
    %c0_48 = arith.constant 0 : index
    %70 = vector.load %arg5[%c4_46, %c0_47, %c0_48] : memref<6x8x128xf32, #tpu.memory_space<vmem>>, vector<1x8x128xf32>
    %71 = vector.shape_cast %70 : vector<1x8x128xf32> to vector<8x128xf32>
    %c5_49 = arith.constant 5 : index
    %c0_50 = arith.constant 0 : index
    %c0_51 = arith.constant 0 : index
    %72 = vector.load %arg5[%c5_49, %c0_50, %c0_51] : memref<6x8x128xf32, #tpu.memory_space<vmem>>, vector<1x8x128xf32>
    %73 = vector.shape_cast %72 : vector<1x8x128xf32> to vector<8x128xf32>
    %c0_52 = arith.constant 0 : index
    %74 = memref.load %arg2[%c0_52] : memref<21xf32, #tpu.memory_space<smem>>
    %75 = vector.broadcast %74 : f32 to vector<8x128xf32>
    %76 = arith.mulf %21, %75 : vector<8x128xf32>
    %c1_53 = arith.constant 1 : index
    %77 = memref.load %arg2[%c1_53] : memref<21xf32, #tpu.memory_space<smem>>
    %78 = vector.broadcast %77 : f32 to vector<8x128xf32>
    %79 = arith.mulf %24, %78 : vector<8x128xf32>
    %80 = arith.addf %76, %79 : vector<8x128xf32>
    %c2_54 = arith.constant 2 : index
    %81 = memref.load %arg2[%c2_54] : memref<21xf32, #tpu.memory_space<smem>>
    %82 = vector.broadcast %81 : f32 to vector<8x128xf32>
    %83 = arith.mulf %27, %82 : vector<8x128xf32>
    %84 = arith.addf %80, %83 : vector<8x128xf32>
    %c3_55 = arith.constant 3 : index
    %85 = memref.load %arg2[%c3_55] : memref<21xf32, #tpu.memory_space<smem>>
    %86 = vector.broadcast %85 : f32 to vector<8x128xf32>
    %87 = arith.mulf %30, %86 : vector<8x128xf32>
    %88 = arith.addf %84, %87 : vector<8x128xf32>
    %c4_56 = arith.constant 4 : index
    %89 = memref.load %arg2[%c4_56] : memref<21xf32, #tpu.memory_space<smem>>
    %90 = vector.broadcast %89 : f32 to vector<8x128xf32>
    %91 = arith.mulf %35, %90 : vector<8x128xf32>
    %92 = arith.addf %88, %91 : vector<8x128xf32>
    %c5_57 = arith.constant 5 : index
    %93 = memref.load %arg2[%c5_57] : memref<21xf32, #tpu.memory_space<smem>>
    %94 = vector.broadcast %93 : f32 to vector<8x128xf32>
    %95 = arith.mulf %38, %94 : vector<8x128xf32>
    %96 = arith.addf %92, %95 : vector<8x128xf32>
    %c6_58 = arith.constant 6 : index
    %97 = memref.load %arg2[%c6_58] : memref<21xf32, #tpu.memory_space<smem>>
    %98 = vector.broadcast %97 : f32 to vector<8x128xf32>
    %99 = arith.mulf %41, %98 : vector<8x128xf32>
    %c7 = arith.constant 7 : index
    %100 = memref.load %arg2[%c7] : memref<21xf32, #tpu.memory_space<smem>>
    %101 = vector.broadcast %100 : f32 to vector<8x128xf32>
    %102 = arith.mulf %44, %101 : vector<8x128xf32>
    %103 = arith.addf %99, %102 : vector<8x128xf32>
    %c8 = arith.constant 8 : index
    %104 = memref.load %arg2[%c8] : memref<21xf32, #tpu.memory_space<smem>>
    %105 = vector.broadcast %104 : f32 to vector<8x128xf32>
    %106 = arith.mulf %49, %105 : vector<8x128xf32>
    %107 = arith.addf %103, %106 : vector<8x128xf32>
    %c9 = arith.constant 9 : index
    %108 = memref.load %arg2[%c9] : memref<21xf32, #tpu.memory_space<smem>>
    %109 = vector.broadcast %108 : f32 to vector<8x128xf32>
    %110 = arith.mulf %51, %109 : vector<8x128xf32>
    %111 = arith.addf %107, %110 : vector<8x128xf32>
    %c10 = arith.constant 10 : index
    %112 = memref.load %arg2[%c10] : memref<21xf32, #tpu.memory_space<smem>>
    %113 = vector.broadcast %112 : f32 to vector<8x128xf32>
    %114 = arith.mulf %53, %113 : vector<8x128xf32>
    %115 = arith.addf %111, %114 : vector<8x128xf32>
    %c11 = arith.constant 11 : index
    %116 = memref.load %arg2[%c11] : memref<21xf32, #tpu.memory_space<smem>>
    %117 = vector.broadcast %116 : f32 to vector<8x128xf32>
    %118 = arith.mulf %55, %117 : vector<8x128xf32>
    %119 = arith.addf %115, %118 : vector<8x128xf32>
    %c12 = arith.constant 12 : index
    %120 = memref.load %arg2[%c12] : memref<21xf32, #tpu.memory_space<smem>>
    %121 = vector.broadcast %120 : f32 to vector<8x128xf32>
    %122 = arith.mulf %57, %121 : vector<8x128xf32>
    %c13 = arith.constant 13 : index
    %123 = memref.load %arg2[%c13] : memref<21xf32, #tpu.memory_space<smem>>
    %124 = vector.broadcast %123 : f32 to vector<8x128xf32>
    %125 = arith.mulf %59, %124 : vector<8x128xf32>
    %126 = arith.addf %122, %125 : vector<8x128xf32>
    %c14 = arith.constant 14 : index
    %127 = memref.load %arg2[%c14] : memref<21xf32, #tpu.memory_space<smem>>
    %128 = vector.broadcast %127 : f32 to vector<8x128xf32>
    %129 = arith.mulf %61, %128 : vector<8x128xf32>
    %130 = arith.addf %126, %129 : vector<8x128xf32>
    %c15 = arith.constant 15 : index
    %131 = memref.load %arg2[%c15] : memref<21xf32, #tpu.memory_space<smem>>
    %132 = vector.broadcast %131 : f32 to vector<8x128xf32>
    %133 = arith.mulf %63, %132 : vector<8x128xf32>
    %134 = arith.addf %130, %133 : vector<8x128xf32>
    %c16 = arith.constant 16 : index
    %135 = memref.load %arg2[%c16] : memref<21xf32, #tpu.memory_space<smem>>
    %136 = vector.broadcast %135 : f32 to vector<8x128xf32>
    %137 = arith.mulf %65, %136 : vector<8x128xf32>
    %138 = arith.addf %134, %137 : vector<8x128xf32>
    %c17 = arith.constant 17 : index
    %139 = memref.load %arg2[%c17] : memref<21xf32, #tpu.memory_space<smem>>
    %140 = vector.broadcast %139 : f32 to vector<8x128xf32>
    %141 = arith.mulf %67, %140 : vector<8x128xf32>
    %142 = arith.addf %138, %141 : vector<8x128xf32>
    %c18 = arith.constant 18 : index
    %143 = memref.load %arg2[%c18] : memref<21xf32, #tpu.memory_space<smem>>
    %144 = vector.broadcast %143 : f32 to vector<8x128xf32>
    %145 = arith.mulf %69, %144 : vector<8x128xf32>
    %c19 = arith.constant 19 : index
    %146 = memref.load %arg2[%c19] : memref<21xf32, #tpu.memory_space<smem>>
    %147 = vector.broadcast %146 : f32 to vector<8x128xf32>
    %148 = arith.mulf %71, %147 : vector<8x128xf32>
    %149 = arith.addf %145, %148 : vector<8x128xf32>
    %c20 = arith.constant 20 : index
    %150 = memref.load %arg2[%c20] : memref<21xf32, #tpu.memory_space<smem>>
    %151 = vector.broadcast %150 : f32 to vector<8x128xf32>
    %152 = arith.mulf %73, %151 : vector<8x128xf32>
    %153 = arith.addf %149, %152 : vector<8x128xf32>
    %154 = arith.addf %96, %119 : vector<8x128xf32>
    %155 = arith.addf %154, %142 : vector<8x128xf32>
    %156 = arith.addf %155, %153 : vector<8x128xf32>
    %c0_59 = arith.constant 0 : index
    %c0_60 = arith.constant 0 : index
    %157 = vector.load %arg18[%c0_59, %c0_60] : memref<8x128xf32, #tpu.memory_space<vmem>>, vector<8x128xf32>
    tpu.vector_store %arg18[%c0_59, %c0_60], %156 {strides = array<i32>} : memref<8x128xf32, #tpu.memory_space<vmem>>, vector<8x128xf32>,
    %c0_61 = arith.constant 0 : index
    %c0_62 = arith.constant 0 : index
    %158 = vector.load %arg7[%c0_61, %c0_62] : memref<8x1xf32, #tpu.memory_space<vmem>>, vector<8x1xf32>
    %c0_63 = arith.constant 0 : index
    %c0_64 = arith.constant 0 : index
    %159 = vector.load %arg8[%c0_63, %c0_64] : memref<8x1xf32, #tpu.memory_space<vmem>>, vector<8x1xf32>
    %160 = tpu.iota {dimensions = array<i32: 0>} : vector<8x1xi32>
    %c0_i32 = arith.constant 0 : i32
    %161 = vector.broadcast %c0_i32 : i32 to vector<8x1xi32>
    %162 = arith.cmpi eq, %160, %161 : vector<8x1xi32>
    %c0_65 = arith.constant 0 : index
    %c0_66 = arith.constant 0 : index
    %163 = vector.load %arg6[%c0_65, %c0_66] : memref<8x128xf32, #tpu.memory_space<vmem>>, vector<8x128xf32>
    %c1_i32 = arith.constant 1 : i32
    %164 = tpu.dynamic_rotate %163 by %c1_i32 dim 0 : vector<8x128xf32>, i32 -> vector<8x128xf32>
    %165 = vector.broadcast %159 : vector<8x1xf32> to vector<8x128xf32>
    %166 = arith.mulf %165, %164 : vector<8x128xf32>
    %c0_67 = arith.constant 0 : index
    %c0_68 = arith.constant 0 : index
    %167 = vector.load %arg18[%c0_67, %c0_68] : memref<8x128xf32, #tpu.memory_space<vmem>>, vector<1x128xf32>
    %168 = vector.shape_cast %162 : vector<8x1xi1> to vector<8x1xi1>
    %169 = vector.broadcast %168 : vector<8x1xi1> to vector<8x128xi1>
    %170 = vector.shape_cast %167 : vector<1x128xf32> to vector<1x128xf32>
    %171 = vector.broadcast %170 : vector<1x128xf32> to vector<8x128xf32>
    %172 = arith.select %169, %171, %166 : vector<8x128xi1>, vector<8x128xf32>
    %173 = vector.broadcast %158 : vector<8x1xf32> to vector<8x128xf32>
    %174 = arith.mulf %173, %163 : vector<8x128xf32>
    %175 = arith.addf %172, %174 : vector<8x128xf32>
    %176 = math.tanh %175 : vector<8x128xf32>
    %c0_i32_69 = arith.constant 0 : i32
    %177 = vector.broadcast %c0_i32_69 : i32 to vector<8x1xi32>
    %178 = arith.cmpi sle, %160, %177 : vector<8x1xi32>
    %179 = vector.shape_cast %178 : vector<8x1xi1> to vector<8x1xi1>
    %180 = vector.broadcast %179 : vector<8x1xi1> to vector<8x128xi1>
    %181 = arith.select %180, %176, %163 : vector<8x128xi1>, vector<8x128xf32>
    %c1_i32_70 = arith.constant 1 : i32
    %182 = tpu.dynamic_rotate %181 by %c1_i32_70 dim 0 : vector<8x128xf32>, i32 -> vector<8x128xf32>
    %183 = vector.broadcast %159 : vector<8x1xf32> to vector<8x128xf32>
    %184 = arith.mulf %183, %182 : vector<8x128xf32>
    %c1_71 = arith.constant 1 : index
    %c0_72 = arith.constant 0 : index
    %185 = vector.load %arg18[%c1_71, %c0_72] : memref<8x128xf32, #tpu.memory_space<vmem>>, vector<1x128xf32>
    %186 = vector.shape_cast %162 : vector<8x1xi1> to vector<8x1xi1>
    %187 = vector.broadcast %186 : vector<8x1xi1> to vector<8x128xi1>
    %188 = vector.shape_cast %185 : vector<1x128xf32> to vector<1x128xf32>
    %189 = vector.broadcast %188 : vector<1x128xf32> to vector<8x128xf32>
    %190 = arith.select %187, %189, %184 : vector<8x128xi1>, vector<8x128xf32>
    %191 = vector.broadcast %158 : vector<8x1xf32> to vector<8x128xf32>
    %192 = arith.mulf %191, %181 : vector<8x128xf32>
    %193 = arith.addf %190, %192 : vector<8x128xf32>
    %194 = math.tanh %193 : vector<8x128xf32>
    %c1_i32_73 = arith.constant 1 : i32
    %195 = vector.broadcast %c1_i32_73 : i32 to vector<8x1xi32>
    %196 = arith.cmpi sle, %160, %195 : vector<8x1xi32>
    %197 = vector.shape_cast %196 : vector<8x1xi1> to vector<8x1xi1>
    %198 = vector.broadcast %197 : vector<8x1xi1> to vector<8x128xi1>
    %199 = arith.select %198, %194, %181 : vector<8x128xi1>, vector<8x128xf32>
    %c1_i32_74 = arith.constant 1 : i32
    %200 = tpu.dynamic_rotate %199 by %c1_i32_74 dim 0 : vector<8x128xf32>, i32 -> vector<8x128xf32>
    %201 = vector.broadcast %159 : vector<8x1xf32> to vector<8x128xf32>
    %202 = arith.mulf %201, %200 : vector<8x128xf32>
    %c2_75 = arith.constant 2 : index
    %c0_76 = arith.constant 0 : index
    %203 = vector.load %arg18[%c2_75, %c0_76] : memref<8x128xf32, #tpu.memory_space<vmem>>, vector<1x128xf32>
    %204 = vector.shape_cast %162 : vector<8x1xi1> to vector<8x1xi1>
    %205 = vector.broadcast %204 : vector<8x1xi1> to vector<8x128xi1>
    %206 = vector.shape_cast %203 : vector<1x128xf32> to vector<1x128xf32>
    %207 = vector.broadcast %206 : vector<1x128xf32> to vector<8x128xf32>
    %208 = arith.select %205, %207, %202 : vector<8x128xi1>, vector<8x128xf32>
    %209 = vector.broadcast %158 : vector<8x1xf32> to vector<8x128xf32>
    %210 = arith.mulf %209, %199 : vector<8x128xf32>
    %211 = arith.addf %208, %210 : vector<8x128xf32>
    %212 = math.tanh %211 : vector<8x128xf32>
    %c2_i32 = arith.constant 2 : i32
    %213 = vector.broadcast %c2_i32 : i32 to vector<8x1xi32>
    %214 = arith.cmpi sle, %160, %213 : vector<8x1xi32>
    %215 = vector.shape_cast %214 : vector<8x1xi1> to vector<8x1xi1>
    %216 = vector.broadcast %215 : vector<8x1xi1> to vector<8x128xi1>
    %217 = arith.select %216, %212, %199 : vector<8x128xi1>, vector<8x128xf32>
    %c1_i32_77 = arith.constant 1 : i32
    %218 = tpu.dynamic_rotate %217 by %c1_i32_77 dim 0 : vector<8x128xf32>, i32 -> vector<8x128xf32>
    %219 = vector.broadcast %159 : vector<8x1xf32> to vector<8x128xf32>
    %220 = arith.mulf %219, %218 : vector<8x128xf32>
    %c3_78 = arith.constant 3 : index
    %c0_79 = arith.constant 0 : index
    %221 = vector.load %arg18[%c3_78, %c0_79] : memref<8x128xf32, #tpu.memory_space<vmem>>, vector<1x128xf32>
    %222 = vector.shape_cast %162 : vector<8x1xi1> to vector<8x1xi1>
    %223 = vector.broadcast %222 : vector<8x1xi1> to vector<8x128xi1>
    %224 = vector.shape_cast %221 : vector<1x128xf32> to vector<1x128xf32>
    %225 = vector.broadcast %224 : vector<1x128xf32> to vector<8x128xf32>
    %226 = arith.select %223, %225, %220 : vector<8x128xi1>, vector<8x128xf32>
    %227 = vector.broadcast %158 : vector<8x1xf32> to vector<8x128xf32>
    %228 = arith.mulf %227, %217 : vector<8x128xf32>
    %229 = arith.addf %226, %228 : vector<8x128xf32>
    %230 = math.tanh %229 : vector<8x128xf32>
    %c3_i32 = arith.constant 3 : i32
    %231 = vector.broadcast %c3_i32 : i32 to vector<8x1xi32>
    %232 = arith.cmpi sle, %160, %231 : vector<8x1xi32>
    %233 = vector.shape_cast %232 : vector<8x1xi1> to vector<8x1xi1>
    %234 = vector.broadcast %233 : vector<8x1xi1> to vector<8x128xi1>
    %235 = arith.select %234, %230, %217 : vector<8x128xi1>, vector<8x128xf32>
    %c1_i32_80 = arith.constant 1 : i32
    %236 = tpu.dynamic_rotate %235 by %c1_i32_80 dim 0 : vector<8x128xf32>, i32 -> vector<8x128xf32>
    %237 = vector.broadcast %159 : vector<8x1xf32> to vector<8x128xf32>
    %238 = arith.mulf %237, %236 : vector<8x128xf32>
    %c4_81 = arith.constant 4 : index
    %c0_82 = arith.constant 0 : index
    %239 = vector.load %arg18[%c4_81, %c0_82] : memref<8x128xf32, #tpu.memory_space<vmem>>, vector<1x128xf32>
    %240 = vector.shape_cast %162 : vector<8x1xi1> to vector<8x1xi1>
    %241 = vector.broadcast %240 : vector<8x1xi1> to vector<8x128xi1>
    %242 = vector.shape_cast %239 : vector<1x128xf32> to vector<1x128xf32>
    %243 = vector.broadcast %242 : vector<1x128xf32> to vector<8x128xf32>
    %244 = arith.select %241, %243, %238 : vector<8x128xi1>, vector<8x128xf32>
    %245 = vector.broadcast %158 : vector<8x1xf32> to vector<8x128xf32>
    %246 = arith.mulf %245, %235 : vector<8x128xf32>
    %247 = arith.addf %244, %246 : vector<8x128xf32>
    %248 = math.tanh %247 : vector<8x128xf32>
    %249 = vector.extract_strided_slice %248 {offsets = [4, 0], sizes = [1, 128], strides = [1, 1]} : vector<8x128xf32> to vector<1x128xf32>
    %c0_83 = arith.constant 0 : index
    %c0_84 = arith.constant 0 : index
    %250 = vector.load %arg19[%c0_83, %c0_84] : memref<1x128xf32, #tpu.memory_space<vmem>>, vector<1x128xf32>
    tpu.vector_store %arg19[%c0_83, %c0_84], %249 {strides = array<i32>} : memref<1x128xf32, #tpu.memory_space<vmem>>, vector<1x128xf32>,
    %c1_i32_85 = arith.constant 1 : i32
    %251 = tpu.dynamic_rotate %248 by %c1_i32_85 dim 0 : vector<8x128xf32>, i32 -> vector<8x128xf32>
    %252 = vector.broadcast %159 : vector<8x1xf32> to vector<8x128xf32>
    %253 = arith.mulf %252, %251 : vector<8x128xf32>
    %c5_86 = arith.constant 5 : index
    %c0_87 = arith.constant 0 : index
    %254 = vector.load %arg18[%c5_86, %c0_87] : memref<8x128xf32, #tpu.memory_space<vmem>>, vector<1x128xf32>
    %255 = vector.shape_cast %162 : vector<8x1xi1> to vector<8x1xi1>
    %256 = vector.broadcast %255 : vector<8x1xi1> to vector<8x128xi1>
    %257 = vector.shape_cast %254 : vector<1x128xf32> to vector<1x128xf32>
    %258 = vector.broadcast %257 : vector<1x128xf32> to vector<8x128xf32>
    %259 = arith.select %256, %258, %253 : vector<8x128xi1>, vector<8x128xf32>
    %260 = vector.broadcast %158 : vector<8x1xf32> to vector<8x128xf32>
    %261 = arith.mulf %260, %248 : vector<8x128xf32>
    %262 = arith.addf %259, %261 : vector<8x128xf32>
    %263 = math.tanh %262 : vector<8x128xf32>
    %c1_i32_88 = arith.constant 1 : i32
    %264 = tpu.dynamic_rotate %263 by %c1_i32_88 dim 0 : vector<8x128xf32>, i32 -> vector<8x128xf32>
    %265 = vector.broadcast %159 : vector<8x1xf32> to vector<8x128xf32>
    %266 = arith.mulf %265, %264 : vector<8x128xf32>
    %c6_89 = arith.constant 6 : index
    %c0_90 = arith.constant 0 : index
    %267 = vector.load %arg18[%c6_89, %c0_90] : memref<8x128xf32, #tpu.memory_space<vmem>>, vector<1x128xf32>
    %268 = vector.shape_cast %162 : vector<8x1xi1> to vector<8x1xi1>
    %269 = vector.broadcast %268 : vector<8x1xi1> to vector<8x128xi1>
    %270 = vector.shape_cast %267 : vector<1x128xf32> to vector<1x128xf32>
    %271 = vector.broadcast %270 : vector<1x128xf32> to vector<8x128xf32>
    %272 = arith.select %269, %271, %266 : vector<8x128xi1>, vector<8x128xf32>
    %273 = vector.broadcast %158 : vector<8x1xf32> to vector<8x128xf32>
    %274 = arith.mulf %273, %263 : vector<8x128xf32>
    %275 = arith.addf %272, %274 : vector<8x128xf32>
    %276 = math.tanh %275 : vector<8x128xf32>
    %c1_i32_91 = arith.constant 1 : i32
    %277 = tpu.dynamic_rotate %276 by %c1_i32_91 dim 0 : vector<8x128xf32>, i32 -> vector<8x128xf32>
    %278 = vector.broadcast %159 : vector<8x1xf32> to vector<8x128xf32>
    %279 = arith.mulf %278, %277 : vector<8x128xf32>
    %c7_92 = arith.constant 7 : index
    %c0_93 = arith.constant 0 : index
    %280 = vector.load %arg18[%c7_92, %c0_93] : memref<8x128xf32, #tpu.memory_space<vmem>>, vector<1x128xf32>
    %281 = vector.shape_cast %162 : vector<8x1xi1> to vector<8x1xi1>
    %282 = vector.broadcast %281 : vector<8x1xi1> to vector<8x128xi1>
    %283 = vector.shape_cast %280 : vector<1x128xf32> to vector<1x128xf32>
    %284 = vector.broadcast %283 : vector<1x128xf32> to vector<8x128xf32>
    %285 = arith.select %282, %284, %279 : vector<8x128xi1>, vector<8x128xf32>
    %286 = vector.broadcast %158 : vector<8x1xf32> to vector<8x128xf32>
    %287 = arith.mulf %286, %276 : vector<8x128xf32>
    %288 = arith.addf %285, %287 : vector<8x128xf32>
    %289 = math.tanh %288 : vector<8x128xf32>
    %290 = vector.extract_strided_slice %289 {offsets = [0, 0], sizes = [1, 128], strides = [1, 1]} : vector<8x128xf32> to vector<1x128xf32>
    %c0_94 = arith.constant 0 : index
    %c0_95 = arith.constant 0 : index
    %291 = vector.load %arg17[%c0_94, %c0_95] : memref<8x128xf32, #tpu.memory_space<vmem>>, vector<1x128xf32>
    tpu.vector_store %arg17[%c0_94, %c0_95], %290 {strides = array<i32>} : memref<8x128xf32, #tpu.memory_space<vmem>>, vector<1x128xf32>,
    %c1_i32_96 = arith.constant 1 : i32
    %292 = tpu.dynamic_rotate %289 by %c1_i32_96 dim 0 : vector<8x128xf32>, i32 -> vector<8x128xf32>
    %293 = vector.broadcast %159 : vector<8x1xf32> to vector<8x128xf32>
    %294 = arith.mulf %293, %292 : vector<8x128xf32>
    %295 = vector.broadcast %158 : vector<8x1xf32> to vector<8x128xf32>
    %296 = arith.mulf %295, %289 : vector<8x128xf32>
    %297 = arith.addf %294, %296 : vector<8x128xf32>
    %298 = math.tanh %297 : vector<8x128xf32>
    %299 = vector.extract_strided_slice %298 {offsets = [1, 0], sizes = [1, 128], strides = [1, 1]} : vector<8x128xf32> to vector<1x128xf32>
    %c1_97 = arith.constant 1 : index
    %c0_98 = arith.constant 0 : index
    %300 = vector.load %arg17[%c1_97, %c0_98] : memref<8x128xf32, #tpu.memory_space<vmem>>, vector<1x128xf32>
    tpu.vector_store %arg17[%c1_97, %c0_98], %299 {strides = array<i32>} : memref<8x128xf32, #tpu.memory_space<vmem>>, vector<1x128xf32>,
    %c1_i32_99 = arith.constant 1 : i32
    %301 = tpu.dynamic_rotate %298 by %c1_i32_99 dim 0 : vector<8x128xf32>, i32 -> vector<8x128xf32>
    %302 = vector.broadcast %159 : vector<8x1xf32> to vector<8x128xf32>
    %303 = arith.mulf %302, %301 : vector<8x128xf32>
    %304 = vector.broadcast %158 : vector<8x1xf32> to vector<8x128xf32>
    %305 = arith.mulf %304, %298 : vector<8x128xf32>
    %306 = arith.addf %303, %305 : vector<8x128xf32>
    %307 = math.tanh %306 : vector<8x128xf32>
    %308 = vector.extract_strided_slice %307 {offsets = [2, 0], sizes = [1, 128], strides = [1, 1]} : vector<8x128xf32> to vector<1x128xf32>
    %c2_100 = arith.constant 2 : index
    %c0_101 = arith.constant 0 : index
    %309 = vector.load %arg17[%c2_100, %c0_101] : memref<8x128xf32, #tpu.memory_space<vmem>>, vector<1x128xf32>
    tpu.vector_store %arg17[%c2_100, %c0_101], %308 {strides = array<i32>} : memref<8x128xf32, #tpu.memory_space<vmem>>, vector<1x128xf32>,
    %c1_i32_102 = arith.constant 1 : i32
    %310 = tpu.dynamic_rotate %307 by %c1_i32_102 dim 0 : vector<8x128xf32>, i32 -> vector<8x128xf32>
    %311 = vector.broadcast %159 : vector<8x1xf32> to vector<8x128xf32>
    %312 = arith.mulf %311, %310 : vector<8x128xf32>
    %313 = vector.broadcast %158 : vector<8x1xf32> to vector<8x128xf32>
    %314 = arith.mulf %313, %307 : vector<8x128xf32>
    %315 = arith.addf %312, %314 : vector<8x128xf32>
    %316 = math.tanh %315 : vector<8x128xf32>
    %317 = vector.extract_strided_slice %316 {offsets = [3, 0], sizes = [1, 128], strides = [1, 1]} : vector<8x128xf32> to vector<1x128xf32>
    %c3_103 = arith.constant 3 : index
    %c0_104 = arith.constant 0 : index
    %318 = vector.load %arg17[%c3_103, %c0_104] : memref<8x128xf32, #tpu.memory_space<vmem>>, vector<1x128xf32>
    tpu.vector_store %arg17[%c3_103, %c0_104], %317 {strides = array<i32>} : memref<8x128xf32, #tpu.memory_space<vmem>>, vector<1x128xf32>,
    %c1_i32_105 = arith.constant 1 : i32
    %319 = tpu.dynamic_rotate %316 by %c1_i32_105 dim 0 : vector<8x128xf32>, i32 -> vector<8x128xf32>
    %320 = vector.broadcast %159 : vector<8x1xf32> to vector<8x128xf32>
    %321 = arith.mulf %320, %319 : vector<8x128xf32>
    %322 = vector.broadcast %158 : vector<8x1xf32> to vector<8x128xf32>
    %323 = arith.mulf %322, %316 : vector<8x128xf32>
    %324 = arith.addf %321, %323 : vector<8x128xf32>
    %325 = math.tanh %324 : vector<8x128xf32>
    %326 = vector.extract_strided_slice %325 {offsets = [4, 0], sizes = [1, 128], strides = [1, 1]} : vector<8x128xf32> to vector<1x128xf32>
    %c4_106 = arith.constant 4 : index
    %c0_107 = arith.constant 0 : index
    %327 = vector.load %arg17[%c4_106, %c0_107] : memref<8x128xf32, #tpu.memory_space<vmem>>, vector<1x128xf32>
    tpu.vector_store %arg17[%c4_106, %c0_107], %326 {strides = array<i32>} : memref<8x128xf32, #tpu.memory_space<vmem>>, vector<1x128xf32>,
    %c0_108 = arith.constant 0 : index
    %c0_109 = arith.constant 0 : index
    %328 = vector.load %arg19[%c0_108, %c0_109] : memref<1x128xf32, #tpu.memory_space<vmem>>, vector<1x128xf32>
    %c0_110 = arith.constant 0 : index
    %c0_111 = arith.constant 0 : index
    %329 = vector.load %arg9[%c0_110, %c0_111] : memref<32x1xf32, #tpu.memory_space<vmem>>, vector<32x1xf32>
    %330 = vector.broadcast %329 : vector<32x1xf32> to vector<32x128xf32>
    %331 = vector.broadcast %328 : vector<1x128xf32> to vector<32x128xf32>
    %332 = arith.mulf %330, %331 : vector<32x128xf32>
    %c0_112 = arith.constant 0 : index
    %c0_113 = arith.constant 0 : index
    %333 = vector.load %arg10[%c0_112, %c0_113] : memref<32x1xf32, #tpu.memory_space<vmem>>, vector<32x1xf32>
    %334 = vector.broadcast %333 : vector<32x1xf32> to vector<32x128xf32>
    %335 = arith.addf %332, %334 : vector<32x128xf32>
    %cst_114 = arith.constant 0.000000e+00 : f32
    %336 = vector.broadcast %cst_114 : f32 to vector<32x128xf32>
    %337 = arith.cmpf oge, %335, %336 : vector<32x128xf32>
    %cst_115 = arith.constant 1.000000e-01 : f32
    %338 = vector.broadcast %cst_115 : f32 to vector<32x128xf32>
    %339 = arith.mulf %338, %335 : vector<32x128xf32>
    %340 = arith.select %337, %335, %339 : vector<32x128xi1>, vector<32x128xf32>
    %c0_116 = arith.constant 0 : index
    %c0_117 = arith.constant 0 : index
    %341 = vector.load %arg11[%c0_116, %c0_117] : memref<32x32xf32, #tpu.memory_space<vmem>>, vector<32x32xf32>
    %cst_118 = arith.constant dense<0.000000e+00> : vector<32x128xf32>
    %342 = tpu.matmul %341, %340, %cst_118 {dimension_numbers = #tpu.dot_dimension_numbers<[1], [0], [0], [1], [0, 0, 1, 1], [], []>} : vector<32x32xf32>, vector<32x128xf32>, vector<32x128xf32> -> vector<32x128xf32>
    %c0_119 = arith.constant 0 : index
    %c0_120 = arith.constant 0 : index
    %343 = vector.load %arg12[%c0_119, %c0_120] : memref<32x1xf32, #tpu.memory_space<vmem>>, vector<32x1xf32>
    %344 = vector.broadcast %343 : vector<32x1xf32> to vector<32x128xf32>
    %345 = arith.addf %342, %344 : vector<32x128xf32>
    %cst_121 = arith.constant 0.000000e+00 : f32
    %346 = vector.broadcast %cst_121 : f32 to vector<32x128xf32>
    %347 = arith.cmpf oge, %345, %346 : vector<32x128xf32>
    %cst_122 = arith.constant 1.000000e-01 : f32
    %348 = vector.broadcast %cst_122 : f32 to vector<32x128xf32>
    %349 = arith.mulf %348, %345 : vector<32x128xf32>
    %350 = arith.select %347, %345, %349 : vector<32x128xi1>, vector<32x128xf32>
    %c0_123 = arith.constant 0 : index
    %c0_124 = arith.constant 0 : index
    %351 = vector.load %arg13[%c0_123, %c0_124] : memref<6x32xf32, #tpu.memory_space<vmem>>, vector<6x32xf32>
    %cst_125 = arith.constant dense<0.000000e+00> : vector<6x128xf32>
    %352 = tpu.matmul %351, %350, %cst_125 {dimension_numbers = #tpu.dot_dimension_numbers<[1], [0], [0], [1], [0, 0, 1, 1], [], []>} : vector<6x32xf32>, vector<32x128xf32>, vector<6x128xf32> -> vector<6x128xf32>
    %c0_126 = arith.constant 0 : index
    %c0_127 = arith.constant 0 : index
    %353 = vector.load %arg16[%c0_126, %c0_127] : memref<6x128xf32, #tpu.memory_space<vmem>>, vector<6x128xf32>
    tpu.vector_store %arg16[%c0_126, %c0_127], %352 {strides = array<i32>} : memref<6x128xf32, #tpu.memory_space<vmem>>, vector<6x128xf32>,
    %c0_128 = arith.constant 0 : index
    %354 = memref.load %arg1[%c0_128] : memref<1xf32, #tpu.memory_space<smem>>
    %c0_129 = arith.constant 0 : index
    %c0_130 = arith.constant 0 : index
    %c0_131 = arith.constant 0 : index
    %355 = vector.load %arg4[%c0_129, %c0_130, %c0_131] : memref<6x8x128xf32, #tpu.memory_space<vmem>>, vector<1x8x128xf32>
    %356 = vector.shape_cast %355 : vector<1x8x128xf32> to vector<8x128xf32>
    %357 = vector.broadcast %354 : f32 to vector<8x128xf32>
    %358 = arith.mulf %356, %357 : vector<8x128xf32>
    %c1_132 = arith.constant 1 : index
    %c0_133 = arith.constant 0 : index
    %c0_134 = arith.constant 0 : index
    %359 = vector.load %arg4[%c1_132, %c0_133, %c0_134] : memref<6x8x128xf32, #tpu.memory_space<vmem>>, vector<1x8x128xf32>
    %360 = vector.shape_cast %359 : vector<1x8x128xf32> to vector<8x128xf32>
    %361 = vector.broadcast %354 : f32 to vector<8x128xf32>
    %362 = arith.mulf %360, %361 : vector<8x128xf32>
    %c2_135 = arith.constant 2 : index
    %c0_136 = arith.constant 0 : index
    %c0_137 = arith.constant 0 : index
    %363 = vector.load %arg4[%c2_135, %c0_136, %c0_137] : memref<6x8x128xf32, #tpu.memory_space<vmem>>, vector<1x8x128xf32>
    %364 = vector.shape_cast %363 : vector<1x8x128xf32> to vector<8x128xf32>
    %365 = vector.broadcast %354 : f32 to vector<8x128xf32>
    %366 = arith.mulf %364, %365 : vector<8x128xf32>
    %c3_138 = arith.constant 3 : index
    %c0_139 = arith.constant 0 : index
    %c0_140 = arith.constant 0 : index
    %367 = vector.load %arg4[%c3_138, %c0_139, %c0_140] : memref<6x8x128xf32, #tpu.memory_space<vmem>>, vector<1x8x128xf32>
    %368 = vector.shape_cast %367 : vector<1x8x128xf32> to vector<8x128xf32>
    %369 = vector.broadcast %354 : f32 to vector<8x128xf32>
    %370 = arith.mulf %368, %369 : vector<8x128xf32>
    %c4_141 = arith.constant 4 : index
    %c0_142 = arith.constant 0 : index
    %c0_143 = arith.constant 0 : index
    %371 = vector.load %arg4[%c4_141, %c0_142, %c0_143] : memref<6x8x128xf32, #tpu.memory_space<vmem>>, vector<1x8x128xf32>
    %372 = vector.shape_cast %371 : vector<1x8x128xf32> to vector<8x128xf32>
    %373 = vector.broadcast %354 : f32 to vector<8x128xf32>
    %374 = arith.mulf %372, %373 : vector<8x128xf32>
    %c5_144 = arith.constant 5 : index
    %c0_145 = arith.constant 0 : index
    %c0_146 = arith.constant 0 : index
    %375 = vector.load %arg4[%c5_144, %c0_145, %c0_146] : memref<6x8x128xf32, #tpu.memory_space<vmem>>, vector<1x8x128xf32>
    %376 = vector.shape_cast %375 : vector<1x8x128xf32> to vector<8x128xf32>
    %377 = vector.broadcast %354 : f32 to vector<8x128xf32>
    %378 = arith.mulf %376, %377 : vector<8x128xf32>
    %379 = arith.mulf %370, %370 : vector<8x128xf32>
    %380 = arith.mulf %374, %374 : vector<8x128xf32>
    %381 = arith.addf %379, %380 : vector<8x128xf32>
    %382 = arith.mulf %378, %378 : vector<8x128xf32>
    %383 = arith.addf %381, %382 : vector<8x128xf32>
    %384 = math.sqrt %383 : vector<8x128xf32>
    %cst_147 = arith.constant 9.99999997E-7 : f32
    %385 = vector.broadcast %cst_147 : f32 to vector<8x128xf32>
    %386 = arith.cmpf olt, %384, %385 : vector<8x128xf32>
    %cst_148 = arith.constant 1.000000e+00 : f32
    %387 = vector.broadcast %cst_148 : f32 to vector<8x128xf32>
    %388 = arith.select %386, %387, %384 : vector<8x128xi1>, vector<8x128xf32>
    %cst_149 = arith.constant 1.000000e+00 : f32
    %389 = vector.broadcast %cst_149 : f32 to vector<8x128xf32>
    %390 = arith.select %386, %389, %383 : vector<8x128xi1>, vector<8x128xf32>
    %cst_150 = arith.constant 5.000000e-01 : f32
    %391 = vector.broadcast %cst_150 : f32 to vector<8x128xf32>
    %392 = arith.mulf %391, %384 : vector<8x128xf32>
    %cst_151 = arith.constant 4.800000e+01 : f32
    %393 = vector.broadcast %cst_151 : f32 to vector<8x128xf32>
    %394 = arith.divf %383, %393 : vector<8x128xf32>
    %cst_152 = arith.constant 5.000000e-01 : f32
    %395 = vector.broadcast %cst_152 : f32 to vector<8x128xf32>
    %396 = arith.subf %395, %394 : vector<8x128xf32>
    %397 = math.sin %392 : vector<8x128xf32>
    %398 = arith.divf %397, %388 : vector<8x128xf32>
    %399 = arith.select %386, %396, %398 : vector<8x128xi1>, vector<8x128xf32>
    %400 = arith.mulf %370, %399 : vector<8x128xf32>
    %401 = arith.mulf %374, %399 : vector<8x128xf32>
    %402 = arith.mulf %378, %399 : vector<8x128xf32>
    %403 = math.cos %392 : vector<8x128xf32>
    %cst_153 = arith.constant 2.400000e+01 : f32
    %404 = vector.broadcast %cst_153 : f32 to vector<8x128xf32>
    %405 = arith.divf %383, %404 : vector<8x128xf32>
    %cst_154 = arith.constant 5.000000e-01 : f32
    %406 = vector.broadcast %cst_154 : f32 to vector<8x128xf32>
    %407 = arith.subf %406, %405 : vector<8x128xf32>
    %408 = math.cos %384 : vector<8x128xf32>
    %cst_155 = arith.constant 1.000000e+00 : f32
    %409 = vector.broadcast %cst_155 : f32 to vector<8x128xf32>
    %410 = arith.subf %409, %408 : vector<8x128xf32>
    %411 = arith.divf %410, %390 : vector<8x128xf32>
    %412 = arith.select %386, %407, %411 : vector<8x128xi1>, vector<8x128xf32>
    %cst_156 = arith.constant 1.200000e+02 : f32
    %413 = vector.broadcast %cst_156 : f32 to vector<8x128xf32>
    %414 = arith.divf %383, %413 : vector<8x128xf32>
    %cst_157 = arith.constant 0.166666672 : f32
    %415 = vector.broadcast %cst_157 : f32 to vector<8x128xf32>
    %416 = arith.subf %415, %414 : vector<8x128xf32>
    %417 = math.sin %384 : vector<8x128xf32>
    %418 = arith.subf %384, %417 : vector<8x128xf32>
    %419 = arith.mulf %390, %388 : vector<8x128xf32>
    %420 = arith.divf %418, %419 : vector<8x128xf32>
    %421 = arith.select %386, %416, %420 : vector<8x128xi1>, vector<8x128xf32>
    %422 = arith.mulf %374, %366 : vector<8x128xf32>
    %423 = arith.mulf %378, %362 : vector<8x128xf32>
    %424 = arith.subf %422, %423 : vector<8x128xf32>
    %425 = arith.mulf %378, %358 : vector<8x128xf32>
    %426 = arith.mulf %370, %366 : vector<8x128xf32>
    %427 = arith.subf %425, %426 : vector<8x128xf32>
    %428 = arith.mulf %370, %362 : vector<8x128xf32>
    %429 = arith.mulf %374, %358 : vector<8x128xf32>
    %430 = arith.subf %428, %429 : vector<8x128xf32>
    %431 = arith.mulf %374, %430 : vector<8x128xf32>
    %432 = arith.mulf %378, %427 : vector<8x128xf32>
    %433 = arith.subf %431, %432 : vector<8x128xf32>
    %434 = arith.mulf %378, %424 : vector<8x128xf32>
    %435 = arith.mulf %370, %430 : vector<8x128xf32>
    %436 = arith.subf %434, %435 : vector<8x128xf32>
    %437 = arith.mulf %370, %427 : vector<8x128xf32>
    %438 = arith.mulf %374, %424 : vector<8x128xf32>
    %439 = arith.subf %437, %438 : vector<8x128xf32>
    %440 = arith.mulf %412, %424 : vector<8x128xf32>
    %441 = arith.addf %358, %440 : vector<8x128xf32>
    %442 = arith.mulf %421, %433 : vector<8x128xf32>
    %443 = arith.addf %441, %442 : vector<8x128xf32>
    %444 = arith.mulf %412, %427 : vector<8x128xf32>
    %445 = arith.addf %362, %444 : vector<8x128xf32>
    %446 = arith.mulf %421, %436 : vector<8x128xf32>
    %447 = arith.addf %445, %446 : vector<8x128xf32>
    %448 = arith.mulf %412, %430 : vector<8x128xf32>
    %449 = arith.addf %366, %448 : vector<8x128xf32>
    %450 = arith.mulf %421, %439 : vector<8x128xf32>
    %451 = arith.addf %449, %450 : vector<8x128xf32>
    %c3_158 = arith.constant 3 : index
    %c0_159 = arith.constant 0 : index
    %c0_160 = arith.constant 0 : index
    %452 = vector.load %arg3[%c3_158, %c0_159, %c0_160] : memref<7x8x128xf32, #tpu.memory_space<vmem>>, vector<1x8x128xf32>
    %453 = vector.shape_cast %452 : vector<1x8x128xf32> to vector<8x128xf32>
    %c4_161 = arith.constant 4 : index
    %c0_162 = arith.constant 0 : index
    %c0_163 = arith.constant 0 : index
    %454 = vector.load %arg3[%c4_161, %c0_162, %c0_163] : memref<7x8x128xf32, #tpu.memory_space<vmem>>, vector<1x8x128xf32>
    %455 = vector.shape_cast %454 : vector<1x8x128xf32> to vector<8x128xf32>
    %c5_164 = arith.constant 5 : index
    %c0_165 = arith.constant 0 : index
    %c0_166 = arith.constant 0 : index
    %456 = vector.load %arg3[%c5_164, %c0_165, %c0_166] : memref<7x8x128xf32, #tpu.memory_space<vmem>>, vector<1x8x128xf32>
    %457 = vector.shape_cast %456 : vector<1x8x128xf32> to vector<8x128xf32>
    %c6_167 = arith.constant 6 : index
    %c0_168 = arith.constant 0 : index
    %c0_169 = arith.constant 0 : index
    %458 = vector.load %arg3[%c6_167, %c0_168, %c0_169] : memref<7x8x128xf32, #tpu.memory_space<vmem>>, vector<1x8x128xf32>
    %459 = vector.shape_cast %458 : vector<1x8x128xf32> to vector<8x128xf32>
    %460 = arith.mulf %453, %453 : vector<8x128xf32>
    %461 = arith.mulf %455, %455 : vector<8x128xf32>
    %462 = arith.mulf %457, %457 : vector<8x128xf32>
    %463 = arith.mulf %453, %455 : vector<8x128xf32>
    %464 = arith.mulf %453, %457 : vector<8x128xf32>
    %465 = arith.mulf %455, %457 : vector<8x128xf32>
    %466 = arith.mulf %459, %453 : vector<8x128xf32>
    %467 = arith.mulf %459, %455 : vector<8x128xf32>
    %468 = arith.mulf %459, %457 : vector<8x128xf32>
    %469 = arith.addf %461, %462 : vector<8x128xf32>
    %cst_170 = arith.constant 2.000000e+00 : f32
    %470 = vector.broadcast %cst_170 : f32 to vector<8x128xf32>
    %471 = arith.mulf %470, %469 : vector<8x128xf32>
    %cst_171 = arith.constant 1.000000e+00 : f32
    %472 = vector.broadcast %cst_171 : f32 to vector<8x128xf32>
    %473 = arith.subf %472, %471 : vector<8x128xf32>
    %474 = arith.subf %463, %468 : vector<8x128xf32>
    %cst_172 = arith.constant 2.000000e+00 : f32
    %475 = vector.broadcast %cst_172 : f32 to vector<8x128xf32>
    %476 = arith.mulf %475, %474 : vector<8x128xf32>
    %477 = arith.addf %464, %467 : vector<8x128xf32>
    %cst_173 = arith.constant 2.000000e+00 : f32
    %478 = vector.broadcast %cst_173 : f32 to vector<8x128xf32>
    %479 = arith.mulf %478, %477 : vector<8x128xf32>
    %480 = arith.addf %463, %468 : vector<8x128xf32>
    %cst_174 = arith.constant 2.000000e+00 : f32
    %481 = vector.broadcast %cst_174 : f32 to vector<8x128xf32>
    %482 = arith.mulf %481, %480 : vector<8x128xf32>
    %483 = arith.addf %460, %462 : vector<8x128xf32>
    %cst_175 = arith.constant 2.000000e+00 : f32
    %484 = vector.broadcast %cst_175 : f32 to vector<8x128xf32>
    %485 = arith.mulf %484, %483 : vector<8x128xf32>
    %cst_176 = arith.constant 1.000000e+00 : f32
    %486 = vector.broadcast %cst_176 : f32 to vector<8x128xf32>
    %487 = arith.subf %486, %485 : vector<8x128xf32>
    %488 = arith.subf %465, %466 : vector<8x128xf32>
    %cst_177 = arith.constant 2.000000e+00 : f32
    %489 = vector.broadcast %cst_177 : f32 to vector<8x128xf32>
    %490 = arith.mulf %489, %488 : vector<8x128xf32>
    %491 = arith.subf %464, %467 : vector<8x128xf32>
    %cst_178 = arith.constant 2.000000e+00 : f32
    %492 = vector.broadcast %cst_178 : f32 to vector<8x128xf32>
    %493 = arith.mulf %492, %491 : vector<8x128xf32>
    %494 = arith.addf %465, %466 : vector<8x128xf32>
    %cst_179 = arith.constant 2.000000e+00 : f32
    %495 = vector.broadcast %cst_179 : f32 to vector<8x128xf32>
    %496 = arith.mulf %495, %494 : vector<8x128xf32>
    %497 = arith.addf %460, %461 : vector<8x128xf32>
    %cst_180 = arith.constant 2.000000e+00 : f32
    %498 = vector.broadcast %cst_180 : f32 to vector<8x128xf32>
    %499 = arith.mulf %498, %497 : vector<8x128xf32>
    %cst_181 = arith.constant 1.000000e+00 : f32
    %500 = vector.broadcast %cst_181 : f32 to vector<8x128xf32>
    %501 = arith.subf %500, %499 : vector<8x128xf32>
    %c0_182 = arith.constant 0 : index
    %c0_183 = arith.constant 0 : index
    %c0_184 = arith.constant 0 : index
    %502 = vector.load %arg3[%c0_182, %c0_183, %c0_184] : memref<7x8x128xf32, #tpu.memory_space<vmem>>, vector<1x8x128xf32>
    %503 = vector.shape_cast %502 : vector<1x8x128xf32> to vector<8x128xf32>
    %504 = arith.mulf %473, %443 : vector<8x128xf32>
    %505 = arith.addf %503, %504 : vector<8x128xf32>
    %506 = arith.mulf %476, %447 : vector<8x128xf32>
    %507 = arith.addf %505, %506 : vector<8x128xf32>
    %508 = arith.mulf %479, %451 : vector<8x128xf32>
    %509 = arith.addf %507, %508 : vector<8x128xf32>
    %c0_185 = arith.constant 0 : index
    %c0_186 = arith.constant 0 : index
    %c0_187 = arith.constant 0 : index
    %510 = vector.load %arg14[%c0_185, %c0_186, %c0_187] : memref<7x8x128xf32, #tpu.memory_space<vmem>>, vector<1x8x128xf32>
    %511 = vector.shape_cast %510 : vector<1x8x128xf32> to vector<8x128xf32>
    %512 = vector.shape_cast %509 : vector<8x128xf32> to vector<1x8x128xf32>
    tpu.vector_store %arg14[%c0_185, %c0_186, %c0_187], %512 {strides = array<i32>} : memref<7x8x128xf32, #tpu.memory_space<vmem>>, vector<1x8x128xf32>,
    %c1_188 = arith.constant 1 : index
    %c0_189 = arith.constant 0 : index
    %c0_190 = arith.constant 0 : index
    %513 = vector.load %arg3[%c1_188, %c0_189, %c0_190] : memref<7x8x128xf32, #tpu.memory_space<vmem>>, vector<1x8x128xf32>
    %514 = vector.shape_cast %513 : vector<1x8x128xf32> to vector<8x128xf32>
    %515 = arith.mulf %482, %443 : vector<8x128xf32>
    %516 = arith.addf %514, %515 : vector<8x128xf32>
    %517 = arith.mulf %487, %447 : vector<8x128xf32>
    %518 = arith.addf %516, %517 : vector<8x128xf32>
    %519 = arith.mulf %490, %451 : vector<8x128xf32>
    %520 = arith.addf %518, %519 : vector<8x128xf32>
    %c1_191 = arith.constant 1 : index
    %c0_192 = arith.constant 0 : index
    %c0_193 = arith.constant 0 : index
    %521 = vector.load %arg14[%c1_191, %c0_192, %c0_193] : memref<7x8x128xf32, #tpu.memory_space<vmem>>, vector<1x8x128xf32>
    %522 = vector.shape_cast %521 : vector<1x8x128xf32> to vector<8x128xf32>
    %523 = vector.shape_cast %520 : vector<8x128xf32> to vector<1x8x128xf32>
    tpu.vector_store %arg14[%c1_191, %c0_192, %c0_193], %523 {strides = array<i32>} : memref<7x8x128xf32, #tpu.memory_space<vmem>>, vector<1x8x128xf32>,
    %c2_194 = arith.constant 2 : index
    %c0_195 = arith.constant 0 : index
    %c0_196 = arith.constant 0 : index
    %524 = vector.load %arg3[%c2_194, %c0_195, %c0_196] : memref<7x8x128xf32, #tpu.memory_space<vmem>>, vector<1x8x128xf32>
    %525 = vector.shape_cast %524 : vector<1x8x128xf32> to vector<8x128xf32>
    %526 = arith.mulf %493, %443 : vector<8x128xf32>
    %527 = arith.addf %525, %526 : vector<8x128xf32>
    %528 = arith.mulf %496, %447 : vector<8x128xf32>
    %529 = arith.addf %527, %528 : vector<8x128xf32>
    %530 = arith.mulf %501, %451 : vector<8x128xf32>
    %531 = arith.addf %529, %530 : vector<8x128xf32>
    %c2_197 = arith.constant 2 : index
    %c0_198 = arith.constant 0 : index
    %c0_199 = arith.constant 0 : index
    %532 = vector.load %arg14[%c2_197, %c0_198, %c0_199] : memref<7x8x128xf32, #tpu.memory_space<vmem>>, vector<1x8x128xf32>
    %533 = vector.shape_cast %532 : vector<1x8x128xf32> to vector<8x128xf32>
    %534 = vector.shape_cast %531 : vector<8x128xf32> to vector<1x8x128xf32>
    tpu.vector_store %arg14[%c2_197, %c0_198, %c0_199], %534 {strides = array<i32>} : memref<7x8x128xf32, #tpu.memory_space<vmem>>, vector<1x8x128xf32>,
    %535 = arith.mulf %459, %400 : vector<8x128xf32>
    %536 = arith.mulf %453, %403 : vector<8x128xf32>
    %537 = arith.addf %535, %536 : vector<8x128xf32>
    %538 = arith.mulf %455, %402 : vector<8x128xf32>
    %539 = arith.addf %537, %538 : vector<8x128xf32>
    %540 = arith.mulf %457, %401 : vector<8x128xf32>
    %541 = arith.subf %539, %540 : vector<8x128xf32>
    %c3_200 = arith.constant 3 : index
    %c0_201 = arith.constant 0 : index
    %c0_202 = arith.constant 0 : index
    %542 = vector.load %arg14[%c3_200, %c0_201, %c0_202] : memref<7x8x128xf32, #tpu.memory_space<vmem>>, vector<1x8x128xf32>
    %543 = vector.shape_cast %542 : vector<1x8x128xf32> to vector<8x128xf32>
    %544 = vector.shape_cast %541 : vector<8x128xf32> to vector<1x8x128xf32>
    tpu.vector_store %arg14[%c3_200, %c0_201, %c0_202], %544 {strides = array<i32>} : memref<7x8x128xf32, #tpu.memory_space<vmem>>, vector<1x8x128xf32>,
    %545 = arith.mulf %459, %401 : vector<8x128xf32>
    %546 = arith.mulf %453, %402 : vector<8x128xf32>
    %547 = arith.subf %545, %546 : vector<8x128xf32>
    %548 = arith.mulf %455, %403 : vector<8x128xf32>
    %549 = arith.addf %547, %548 : vector<8x128xf32>
    %550 = arith.mulf %457, %400 : vector<8x128xf32>
    %551 = arith.addf %549, %550 : vector<8x128xf32>
    %c4_203 = arith.constant 4 : index
    %c0_204 = arith.constant 0 : index
    %c0_205 = arith.constant 0 : index
    %552 = vector.load %arg14[%c4_203, %c0_204, %c0_205] : memref<7x8x128xf32, #tpu.memory_space<vmem>>, vector<1x8x128xf32>
    %553 = vector.shape_cast %552 : vector<1x8x128xf32> to vector<8x128xf32>
    %554 = vector.shape_cast %551 : vector<8x128xf32> to vector<1x8x128xf32>
    tpu.vector_store %arg14[%c4_203, %c0_204, %c0_205], %554 {strides = array<i32>} : memref<7x8x128xf32, #tpu.memory_space<vmem>>, vector<1x8x128xf32>,
    %555 = arith.mulf %459, %402 : vector<8x128xf32>
    %556 = arith.mulf %453, %401 : vector<8x128xf32>
    %557 = arith.addf %555, %556 : vector<8x128xf32>
    %558 = arith.mulf %455, %400 : vector<8x128xf32>
    %559 = arith.subf %557, %558 : vector<8x128xf32>
    %560 = arith.mulf %457, %403 : vector<8x128xf32>
    %561 = arith.addf %559, %560 : vector<8x128xf32>
    %c5_206 = arith.constant 5 : index
    %c0_207 = arith.constant 0 : index
    %c0_208 = arith.constant 0 : index
    %562 = vector.load %arg14[%c5_206, %c0_207, %c0_208] : memref<7x8x128xf32, #tpu.memory_space<vmem>>, vector<1x8x128xf32>
    %563 = vector.shape_cast %562 : vector<1x8x128xf32> to vector<8x128xf32>
    %564 = vector.shape_cast %561 : vector<8x128xf32> to vector<1x8x128xf32>
    tpu.vector_store %arg14[%c5_206, %c0_207, %c0_208], %564 {strides = array<i32>} : memref<7x8x128xf32, #tpu.memory_space<vmem>>, vector<1x8x128xf32>,
    %565 = arith.mulf %459, %403 : vector<8x128xf32>
    %566 = arith.mulf %453, %400 : vector<8x128xf32>
    %567 = arith.subf %565, %566 : vector<8x128xf32>
    %568 = arith.mulf %455, %401 : vector<8x128xf32>
    %569 = arith.subf %567, %568 : vector<8x128xf32>
    %570 = arith.mulf %457, %402 : vector<8x128xf32>
    %571 = arith.subf %569, %570 : vector<8x128xf32>
    %c6_209 = arith.constant 6 : index
    %c0_210 = arith.constant 0 : index
    %c0_211 = arith.constant 0 : index
    %572 = vector.load %arg14[%c6_209, %c0_210, %c0_211] : memref<7x8x128xf32, #tpu.memory_space<vmem>>, vector<1x8x128xf32>
    %573 = vector.shape_cast %572 : vector<1x8x128xf32> to vector<8x128xf32>
    %574 = vector.shape_cast %571 : vector<8x128xf32> to vector<1x8x128xf32>
    tpu.vector_store %arg14[%c6_209, %c0_210, %c0_211], %574 {strides = array<i32>} : memref<7x8x128xf32, #tpu.memory_space<vmem>>, vector<1x8x128xf32>,
    %c0_212 = arith.constant 0 : index
    %c0_213 = arith.constant 0 : index
    %c0_214 = arith.constant 0 : index
    %575 = vector.load %arg4[%c0_212, %c0_213, %c0_214] : memref<6x8x128xf32, #tpu.memory_space<vmem>>, vector<1x8x128xf32>
    %576 = vector.shape_cast %575 : vector<1x8x128xf32> to vector<8x128xf32>
    %577 = vector.extract_strided_slice %352 {offsets = [0, 0], sizes = [1, 128], strides = [1, 1]} : vector<6x128xf32> to vector<1x128xf32>
    %578 = vector.broadcast %577 : vector<1x128xf32> to vector<8x128xf32>
    %579 = arith.addf %576, %578 : vector<8x128xf32>
    %c0_215 = arith.constant 0 : index
    %c0_216 = arith.constant 0 : index
    %c0_217 = arith.constant 0 : index
    %580 = vector.load %arg15[%c0_215, %c0_216, %c0_217] : memref<6x8x128xf32, #tpu.memory_space<vmem>>, vector<1x8x128xf32>
    %581 = vector.shape_cast %580 : vector<1x8x128xf32> to vector<8x128xf32>
    %582 = vector.shape_cast %579 : vector<8x128xf32> to vector<1x8x128xf32>
    tpu.vector_store %arg15[%c0_215, %c0_216, %c0_217], %582 {strides = array<i32>} : memref<6x8x128xf32, #tpu.memory_space<vmem>>, vector<1x8x128xf32>,
    %c1_218 = arith.constant 1 : index
    %c0_219 = arith.constant 0 : index
    %c0_220 = arith.constant 0 : index
    %583 = vector.load %arg4[%c1_218, %c0_219, %c0_220] : memref<6x8x128xf32, #tpu.memory_space<vmem>>, vector<1x8x128xf32>
    %584 = vector.shape_cast %583 : vector<1x8x128xf32> to vector<8x128xf32>
    %585 = vector.extract_strided_slice %352 {offsets = [1, 0], sizes = [1, 128], strides = [1, 1]} : vector<6x128xf32> to vector<1x128xf32>
    %586 = vector.broadcast %585 : vector<1x128xf32> to vector<8x128xf32>
    %587 = arith.addf %584, %586 : vector<8x128xf32>
    %c1_221 = arith.constant 1 : index
    %c0_222 = arith.constant 0 : index
    %c0_223 = arith.constant 0 : index
    %588 = vector.load %arg15[%c1_221, %c0_222, %c0_223] : memref<6x8x128xf32, #tpu.memory_space<vmem>>, vector<1x8x128xf32>
    %589 = vector.shape_cast %588 : vector<1x8x128xf32> to vector<8x128xf32>
    %590 = vector.shape_cast %587 : vector<8x128xf32> to vector<1x8x128xf32>
    tpu.vector_store %arg15[%c1_221, %c0_222, %c0_223], %590 {strides = array<i32>} : memref<6x8x128xf32, #tpu.memory_space<vmem>>, vector<1x8x128xf32>,
    %c2_224 = arith.constant 2 : index
    %c0_225 = arith.constant 0 : index
    %c0_226 = arith.constant 0 : index
    %591 = vector.load %arg4[%c2_224, %c0_225, %c0_226] : memref<6x8x128xf32, #tpu.memory_space<vmem>>, vector<1x8x128xf32>
    %592 = vector.shape_cast %591 : vector<1x8x128xf32> to vector<8x128xf32>
    %593 = vector.extract_strided_slice %352 {offsets = [2, 0], sizes = [1, 128], strides = [1, 1]} : vector<6x128xf32> to vector<1x128xf32>
    %594 = vector.broadcast %593 : vector<1x128xf32> to vector<8x128xf32>
    %595 = arith.addf %592, %594 : vector<8x128xf32>
    %c2_227 = arith.constant 2 : index
    %c0_228 = arith.constant 0 : index
    %c0_229 = arith.constant 0 : index
    %596 = vector.load %arg15[%c2_227, %c0_228, %c0_229] : memref<6x8x128xf32, #tpu.memory_space<vmem>>, vector<1x8x128xf32>
    %597 = vector.shape_cast %596 : vector<1x8x128xf32> to vector<8x128xf32>
    %598 = vector.shape_cast %595 : vector<8x128xf32> to vector<1x8x128xf32>
    tpu.vector_store %arg15[%c2_227, %c0_228, %c0_229], %598 {strides = array<i32>} : memref<6x8x128xf32, #tpu.memory_space<vmem>>, vector<1x8x128xf32>,
    %c3_230 = arith.constant 3 : index
    %c0_231 = arith.constant 0 : index
    %c0_232 = arith.constant 0 : index
    %599 = vector.load %arg4[%c3_230, %c0_231, %c0_232] : memref<6x8x128xf32, #tpu.memory_space<vmem>>, vector<1x8x128xf32>
    %600 = vector.shape_cast %599 : vector<1x8x128xf32> to vector<8x128xf32>
    %601 = vector.extract_strided_slice %352 {offsets = [3, 0], sizes = [1, 128], strides = [1, 1]} : vector<6x128xf32> to vector<1x128xf32>
    %602 = vector.broadcast %601 : vector<1x128xf32> to vector<8x128xf32>
    %603 = arith.addf %600, %602 : vector<8x128xf32>
    %c3_233 = arith.constant 3 : index
    %c0_234 = arith.constant 0 : index
    %c0_235 = arith.constant 0 : index
    %604 = vector.load %arg15[%c3_233, %c0_234, %c0_235] : memref<6x8x128xf32, #tpu.memory_space<vmem>>, vector<1x8x128xf32>
    %605 = vector.shape_cast %604 : vector<1x8x128xf32> to vector<8x128xf32>
    %606 = vector.shape_cast %603 : vector<8x128xf32> to vector<1x8x128xf32>
    tpu.vector_store %arg15[%c3_233, %c0_234, %c0_235], %606 {strides = array<i32>} : memref<6x8x128xf32, #tpu.memory_space<vmem>>, vector<1x8x128xf32>,
    %c4_236 = arith.constant 4 : index
    %c0_237 = arith.constant 0 : index
    %c0_238 = arith.constant 0 : index
    %607 = vector.load %arg4[%c4_236, %c0_237, %c0_238] : memref<6x8x128xf32, #tpu.memory_space<vmem>>, vector<1x8x128xf32>
    %608 = vector.shape_cast %607 : vector<1x8x128xf32> to vector<8x128xf32>
    %609 = vector.extract_strided_slice %352 {offsets = [4, 0], sizes = [1, 128], strides = [1, 1]} : vector<6x128xf32> to vector<1x128xf32>
    %610 = vector.broadcast %609 : vector<1x128xf32> to vector<8x128xf32>
    %611 = arith.addf %608, %610 : vector<8x128xf32>
    %c4_239 = arith.constant 4 : index
    %c0_240 = arith.constant 0 : index
    %c0_241 = arith.constant 0 : index
    %612 = vector.load %arg15[%c4_239, %c0_240, %c0_241] : memref<6x8x128xf32, #tpu.memory_space<vmem>>, vector<1x8x128xf32>
    %613 = vector.shape_cast %612 : vector<1x8x128xf32> to vector<8x128xf32>
    %614 = vector.shape_cast %611 : vector<8x128xf32> to vector<1x8x128xf32>
    tpu.vector_store %arg15[%c4_239, %c0_240, %c0_241], %614 {strides = array<i32>} : memref<6x8x128xf32, #tpu.memory_space<vmem>>, vector<1x8x128xf32>,
    %c5_242 = arith.constant 5 : index
    %c0_243 = arith.constant 0 : index
    %c0_244 = arith.constant 0 : index
    %615 = vector.load %arg4[%c5_242, %c0_243, %c0_244] : memref<6x8x128xf32, #tpu.memory_space<vmem>>, vector<1x8x128xf32>
    %616 = vector.shape_cast %615 : vector<1x8x128xf32> to vector<8x128xf32>
    %617 = vector.extract_strided_slice %352 {offsets = [5, 0], sizes = [1, 128], strides = [1, 1]} : vector<6x128xf32> to vector<1x128xf32>
    %618 = vector.broadcast %617 : vector<1x128xf32> to vector<8x128xf32>
    %619 = arith.addf %616, %618 : vector<8x128xf32>
    %c5_245 = arith.constant 5 : index
    %c0_246 = arith.constant 0 : index
    %c0_247 = arith.constant 0 : index
    %620 = vector.load %arg15[%c5_245, %c0_246, %c0_247] : memref<6x8x128xf32, #tpu.memory_space<vmem>>, vector<1x8x128xf32>
    %621 = vector.shape_cast %620 : vector<1x8x128xf32> to vector<8x128xf32>
    %622 = vector.shape_cast %619 : vector<8x128xf32> to vector<1x8x128xf32>
    tpu.vector_store %arg15[%c5_245, %c0_246, %c0_247], %622 {strides = array<i32>} : memref<6x8x128xf32, #tpu.memory_space<vmem>>, vector<1x8x128xf32>,
    return
  }
  func.func @transform_0(%arg0: i32) -> i32 {
    %c0_i32 = arith.constant 0 : i32
    %c0_i32_0 = arith.constant 0 : i32
    return %c0_i32 : i32
  }
  func.func @transform_1(%arg0: i32) -> i32 {
    %c0_i32 = arith.constant 0 : i32
    %c0_i32_0 = arith.constant 0 : i32
    return %c0_i32 : i32
  }
  func.func @transform_2(%arg0: i32) -> (i32, i32, i32) {
    %c0_i32 = arith.constant 0 : i32
    %c0_i32_0 = arith.constant 0 : i32
    %c0_i32_1 = arith.constant 0 : i32
    return %c0_i32, %c0_i32_0, %arg0 : i32, i32, i32
  }
  func.func @transform_3(%arg0: i32) -> (i32, i32, i32) {
    %c0_i32 = arith.constant 0 : i32
    %c0_i32_0 = arith.constant 0 : i32
    %c0_i32_1 = arith.constant 0 : i32
    return %c0_i32, %c0_i32_0, %arg0 : i32, i32, i32
  }
  func.func @transform_4(%arg0: i32) -> (i32, i32, i32) {
    %c0_i32 = arith.constant 0 : i32
    %c0_i32_0 = arith.constant 0 : i32
    %c0_i32_1 = arith.constant 0 : i32
    return %c0_i32, %c0_i32_0, %arg0 : i32, i32, i32
  }
  func.func @transform_5(%arg0: i32) -> (i32, i32) {
    %c0_i32 = arith.constant 0 : i32
    %c0_i32_0 = arith.constant 0 : i32
    return %c0_i32, %arg0 : i32, i32
  }
  func.func @transform_6(%arg0: i32) -> (i32, i32) {
    %c0_i32 = arith.constant 0 : i32
    %c0_i32_0 = arith.constant 0 : i32
    %c0_i32_1 = arith.constant 0 : i32
    return %c0_i32, %c0_i32_0 : i32, i32
  }
  func.func @transform_7(%arg0: i32) -> (i32, i32) {
    %c0_i32 = arith.constant 0 : i32
    %c0_i32_0 = arith.constant 0 : i32
    %c0_i32_1 = arith.constant 0 : i32
    return %c0_i32, %c0_i32_0 : i32, i32
  }
  func.func @transform_8(%arg0: i32) -> (i32, i32) {
    %c0_i32 = arith.constant 0 : i32
    %c0_i32_0 = arith.constant 0 : i32
    %c0_i32_1 = arith.constant 0 : i32
    return %c0_i32, %c0_i32_0 : i32, i32
  }
  func.func @transform_9(%arg0: i32) -> (i32, i32) {
    %c0_i32 = arith.constant 0 : i32
    %c0_i32_0 = arith.constant 0 : i32
    %c0_i32_1 = arith.constant 0 : i32
    return %c0_i32, %c0_i32_0 : i32, i32
  }
  func.func @transform_10(%arg0: i32) -> (i32, i32) {
    %c0_i32 = arith.constant 0 : i32
    %c0_i32_0 = arith.constant 0 : i32
    %c0_i32_1 = arith.constant 0 : i32
    return %c0_i32, %c0_i32_0 : i32, i32
  }
  func.func @transform_11(%arg0: i32) -> (i32, i32) {
    %c0_i32 = arith.constant 0 : i32
    %c0_i32_0 = arith.constant 0 : i32
    %c0_i32_1 = arith.constant 0 : i32
    return %c0_i32, %c0_i32_0 : i32, i32
  }
  func.func @transform_12(%arg0: i32) -> (i32, i32) {
    %c0_i32 = arith.constant 0 : i32
    %c0_i32_0 = arith.constant 0 : i32
    %c0_i32_1 = arith.constant 0 : i32
    return %c0_i32, %c0_i32_0 : i32, i32
  }
  func.func @transform_13(%arg0: i32) -> (i32, i32, i32) {
    %c0_i32 = arith.constant 0 : i32
    %c0_i32_0 = arith.constant 0 : i32
    %c0_i32_1 = arith.constant 0 : i32
    return %c0_i32, %c0_i32_0, %arg0 : i32, i32, i32
  }
  func.func @transform_14(%arg0: i32) -> (i32, i32, i32) {
    %c0_i32 = arith.constant 0 : i32
    %c0_i32_0 = arith.constant 0 : i32
    %c0_i32_1 = arith.constant 0 : i32
    return %c0_i32, %c0_i32_0, %arg0 : i32, i32, i32
  }
  func.func @transform_15(%arg0: i32) -> (i32, i32) {
    %c0_i32 = arith.constant 0 : i32
    %c0_i32_0 = arith.constant 0 : i32
    return %c0_i32, %arg0 : i32, i32
  }
  func.func @transform_16(%arg0: i32) -> (i32, i32) {
    %c0_i32 = arith.constant 0 : i32
    %c0_i32_0 = arith.constant 0 : i32
    return %c0_i32, %arg0 : i32, i32
  }
}

</mosaic_0001>

<bundles_post_ra>
// kernel: tpu_custom_call.1
= control target key start
LH: loop header
LB: loop body
LE: loop exit
PB: predicated region body
PF: predicated region fallthrough
CT: control target
= control target key end

     0   :  { %s2744_s0 = inlined_call_operand.<no memory space> [shape: f32[1], index: 0, kind: input, shape index: {}]   ;;  %s2745_s1 = inlined_call_operand.vmem [shape: f32[21], index: 1, kind: input, shape index: {}]   ;;  %s2746_s2 = inlined_call_operand.hbm [shape: f32[7,8,128], index: 2, kind: input, shape index: {}, may-alias: {2,13}]   ;;  %s2747_s3 = inlined_call_operand.hbm [shape: f32[6,8,128], index: 3, kind: input, shape index: {}, may-alias: {3,14}]   ;;  %s2748_s4 = inlined_call_operand.vmem [shape: f32[6,8,128], index: 4, kind: input, shape index: {}]   ;;  %s2749_s5 = inlined_call_operand.hbm [shape: f32[8,128], index: 5, kind: input, shape index: {}, may-alias: {5,16}]   ;;  %s2750_s6 = inlined_call_operand.vmem [shape: f32[8,1], index: 6, kind: input, shape index: {}]   ;;  %s2751_s7 = inlined_call_operand.vmem [shape: f32[8,1], index: 7, kind: input, shape index: {}]   ;;  %s2752_s8 = inlined_call_operand.vmem [shape: f32[32,1], index: 8, kind: input, shape index: {}]   ;;  %s2753_s9 = inlined_call_operand.vmem [shape: f32[32,1], index: 9, kind: input, shape index: {}]   ;;  %s2754_s10 = inlined_call_operand.vmem [shape: f32[32,32], index: 10, kind: input, shape index: {}]   ;;  %s2755_s11 = inlined_call_operand.vmem [shape: f32[32,1], index: 11, kind: input, shape index: {}]   ;;  %s2756_s12 = inlined_call_operand.vmem [shape: f32[6,32], index: 12, kind: input, shape index: {}]   ;;  %s2757_s13 = inlined_call_operand.hbm [shape: f32[7,8,128], index: 13, kind: output, shape index: {0}, may-alias: {2,13}]   ;;  %s2758_s14 = inlined_call_operand.hbm [shape: f32[6,8,128], index: 14, kind: output, shape index: {1}, may-alias: {3,14}]   ;;  %s2759_s15 = inlined_call_operand.hbm [shape: f32[6,128], index: 15, kind: output, shape index: {2}]   ;;  %s2760_s16 = inlined_call_operand.hbm [shape: f32[8,128], index: 16, kind: output, shape index: {3}, may-alias: {5,16}]  }
   0x1   :  { %2761 = sst [smem:[#allocation25_spill]] %s2744_s0 }
   0x2   :  { %23 = vsyncpa [#allocation8], 0 }
   0x3   :  { %24 = vsyncpa [#allocation6], 0 }
   0x4   :  { %25 = vsyncpa [#allocation11], 0 }
   0x5   :  { %26 = vsyncpa [#allocation7], 0 }
   0x6   :  { %27 = vsyncpa [#allocation15], 0 }
   0x7   :  { %28 = vsyncpa [#allocation18], 0  ;;  %s57_s23 = sshll.u32 %s2747_s3, 4  ;;  %s1836_s24 = smov [#allocation10]   ;;  %s58_s23 = int_to_ptr.hbm [resolvable:$true] %s57_s23 }
   0x8   :  { %s59_s25 = sshll.u32 %s1836_s24, 4  ;;  %s36_s28 = sshll.u32 %s2745_s1, 4  ;;  %s60_s25 = int_to_ptr.vmem [resolvable:$true] %s59_s25  ;;  %s37_s28 = int_to_ptr.vmem [resolvable:$true] %s36_s28 }
   0x9   :  { %s1837_s29 = smov 128   ;;  %s1838_s30 = smov 8  }
   0xa   :  { %65 = dma.hbm_to_vmem [thread:$0]  %s58_s23, 768, %s60_s25, [#allocation11], %s1837_s29, %s1837_s29, %s1838_s30  }
   0xb   :  { %s1839_s0 = smov [#allocation5]   ;;  %s44_s3 = sshll.u32 %s2746_s2, 4  ;;  %s45_s3 = int_to_ptr.hbm [resolvable:$true] %s44_s3 }
   0xc   :  { %39 = dma.vmem_to_smem %s37_s28, 16, %s1839_s0, [#allocation8]  }
   0xd   :  { %s1840_s19 = smov [#allocation9]   ;;  %s73_s1 = sshll.u32 %s2749_s5, 4  ;;  %s74_s1 = int_to_ptr.hbm [resolvable:$true] %s73_s1 }
   0xe   :  { %s46_s20 = sshll.u32 %s1840_s19, 4  ;;  %s1841_s23 = smov [#allocation12]   ;;  %s47_s20 = int_to_ptr.vmem [resolvable:$true] %s46_s20 }
   0xf   :  { %52 = dma.hbm_to_vmem [thread:$0]  %s45_s3, 896, %s47_s20, [#allocation6], %s1837_s29, %s1837_s29, %s1838_s30  }
  0x10   :  { %s75_s24 = sshll.u32 %s1841_s23, 4  ;;  %s76_s24 = int_to_ptr.vmem [resolvable:$true] %s75_s24 }
  0x11   :  { %78 = dma.hbm_to_vmem [thread:$0]  %s74_s1, 128, %s76_s24, [#allocation11]  }
  0x12   :  { %1824 = dma.done.wait [#allocation8], 16  }
  0x13   :  { %1825 = vsyncadd [#allocation8], 4294967280 }
  0x14   :  { %1826 = dma.done.wait [#allocation6], 896  }
  0x15   :  { %1827 = vsyncadd [#allocation6], 4294966400 }
  0x16   :  { %1828 = dma.done.wait [#allocation11], 896  }
  0x17   :  { %1829 = vsyncadd [#allocation11], 4294966400 }
  0x18   :  { %109 = sfence }
  0x19   :  { %v255_v0 = vld [vmem:[%s2751_s7] sm:$0xff]  ;;  %v1842_v1 = vmov 0   ;;  %v382_v2 = vld [vmem:[%s2752_s8 + $0x18] sm:$0xff]  ;;  %v381_v5 = vld [vmem:[%s2752_s8 + $0x10] sm:$0xff]  ;;  %s2006_s17 = sld [smem:[#allocation5 + $0x1]]  ;;  %vm478_vm9 = vcmask 261120  }
  0x1a   :  { %1588 = vset.pattern.permute.xlu0 %v1842_v1  ;;  %1589 = vset.pattern.permute.xlu1 %v1842_v1  ;;  %v413_v3 = vld [vmem:[%s2753_s9 + $0x18] sm:$0xff]  ;;  %v254_v4 = vld [vmem:[%s2750_s6] sm:$0xff]  ;;  %v380_v6 = vld [vmem:[%s2752_s8 + $0x8] sm:$0xff]  ;;  %s2008_s18 = sld [smem:[#allocation5 + $0x2]] }
  0x1b   :  { %263 = vperm.xlu0 %1588, %v255_v0   ;;  %1590 = vset.pattern.permute.xlu2 %v1842_v1  ;;  %v412_v7 = vld [vmem:[%s2753_s9 + $0x10] sm:$0xff]  ;;  %v379_v8 = vld [vmem:[%s2752_s8] sm:$0xff]  ;;  %v411_v9 = vld [vmem:[%s2753_s9 + $0x8] sm:$0xff]  ;;  %s2010_s3 = sld [smem:[#allocation5 + $0x3]] }
  0x1c   :  { %400 = vperm.xlu1 %1589, %v382_v2   ;;  %431 = vperm.xlu2 %1590, %v413_v3   ;;  %v410_v10 = vld [vmem:[%s2753_s9] sm:$0xff]  ;;  %v457_v11 = vld [vmem:[%s2755_s11 + $0x18] sm:$0xff]  ;;  %v456_v12 = vld [vmem:[%s2755_s11 + $0x10] sm:$0xff]  ;;  %s2004_s9 = sld [smem:[#allocation5]] }
  0x1d   :  { %v455_v13 = vld [vmem:[%s2755_s11 + $0x8] sm:$0xff]  ;;  %v454_v14 = vld [vmem:[%s2755_s11] sm:$0xff]  ;;  %s2012_s19 = sld [smem:[#allocation5 + $0x4]]  ;;  %v115_v16 = vld [vmem:[#allocation9 + $0x28] sm:$0xff] }
  0x1e   :  { %v113_v15 = vld [vmem:[#allocation9 + $0x20] sm:$0xff]  ;;  %s2014_s20 = sld [smem:[#allocation5 + $0x5]]  ;;  %v120_v18 = vmul.f32 %v115_v16, %v115_v16  ;;  %v111_v19 = vld [vmem:[#allocation9 + $0x18] sm:$0xff]  ;;  %v117_v20 = vld [vmem:[#allocation9 + $0x30] sm:$0xff] }
  0x1f   :  { %v119_v17 = vmul.f32 %v113_v15, %v113_v15  ;;  %s2016_s21 = sld [smem:[#allocation5 + $0x6]]  ;;  %v118_v21 = vmul.f32 %v111_v19, %v111_v19  ;;  %v121_v22 = vmul.f32 %v113_v15, %v111_v19  ;;  %v122_v23 = vmul.f32 %v115_v16, %v111_v19  ;;  %v148_v58 = vld [vmem:[#allocation10] sm:$0xff]  ;;  %v150_v3 = vld [vmem:[#allocation10 + $0x8] sm:$0xff] }
  0x20   :  { %s2018_s11 = sld [smem:[#allocation5 + $0x7]]  ;;  %v123_v24 = vmul.f32 %v115_v16, %v113_v15  ;;  %v124_v25 = vmul.f32 %v117_v20, %v111_v19  ;;  %v125_v26 = vmul.f32 %v117_v20, %v113_v15  ;;  %v126_v27 = vmul.f32 %v117_v20, %v115_v16 }
  0x21   :  { %s2020_s22 = sld [smem:[#allocation5 + $0x8]]  ;;  %v127_v28 = vadd.f32 %v120_v18, %v119_v17  ;;  %v145_v29 = vadd.f32 %v119_v17, %v118_v21  ;;  %v136_v42 = vadd.f32 %v120_v18, %v118_v21  ;;  %v174_v45 = vstv %s2006_s17  ;;  %s1492_s17 = sshll.u32 %s2760_s16, 4  ;;  %s1493_s17 = int_to_ptr.hbm [resolvable:$true] %s1492_s17 }
  0x22   :  { %s2022_s1 = sld [smem:[#allocation5 + $0x9]]  ;;  %v130_v31 = vsub.f32 %v121_v22, %v126_v27  ;;  %v141_v32 = vsub.f32 %v122_v23, %v125_v26  ;;  %v143_v33 = vadd.f32 %v124_v25, %v123_v24  ;;  %v132_v34 = vadd.f32 %v125_v26, %v122_v23  ;;  %s1853_s16 = smov [#allocation14]  }
  0x23   :  { %274 = vperm.xlu0 %1588, %v254_v4   ;;  %s2024_s6 = sld [smem:[#allocation5 + $0xa]]  ;;  %v128_v30 = vmul.f32 2.0, %v127_v28  ;;  %v146_v35 = vmul.f32 2.0, %v145_v29  ;;  %v134_v41 = vadd.f32 %v126_v27, %v121_v22  ;;  %v171_v44 = vstv %s2004_s9  ;;  %v159_v22 = vld [vmem:[%s2748_s4] sm:$0xff]  ;;  %v1518_v27 = vld [vmem:[%s2748_s4 + $0x8] sm:$0xff] }
  0x24   :  { %395 = vperm.xlu1 %1589, %v381_v5   ;;  %390 = vperm.xlu2 %1590, %v380_v6   ;;  %s2026_s23 = sld [smem:[#allocation5 + $0xb]]  ;;  %v131_v37 = vmul.f32 2.0, %v130_v31  ;;  %v142_v38 = vmul.f32 2.0, %v141_v32  ;;  %v144_v39 = vmul.f32 2.0, %v143_v33  ;;  %v133_v40 = vmul.f32 2.0, %v132_v34  ;;  %v1520_v32 = vld [vmem:[%s2748_s4 + $0x18] sm:$0xff] }
  0x25   :  { %s2028_s24 = sld [smem:[#allocation5 + $0xc]]  ;;  %v129_v36 = vsub.f32 1.0, %v128_v30  ;;  %v147_v43 = vsub.f32 1.0, %v146_v35  ;;  %v178_v46 = vstv %s2008_s18  ;;  %v194_v47 = vstv %s2016_s21  ;;  %v1521_v33 = vld [vmem:[%s2748_s4 + $0x20] sm:$0xff]  ;;  %s1849_s18 = smov [#allocation17]  }
  0x26   :  { %s2030_s2 = sld [smem:[#allocation5 + $0xd]]  ;;  %v135_v48 = vmul.f32 2.0, %v134_v41  ;;  %v137_v49 = vmul.f32 2.0, %v136_v42  ;;  %v175_v51 = vmul.f32 %v174_v45, %v131_v37  ;;  %v179_v52 = vmul.f32 %v178_v46, %v133_v40  ;;  %v1522_v41 = vld [vmem:[%s2748_s4 + $0x28] sm:$0xff] }
  0x27   :  { %s2032_s25 = sld [smem:[#allocation5 + $0xe]]  ;;  %v172_v50 = vmul.f32 %v171_v44, %v129_v36  ;;  %v182_v53 = vstv %s2010_s3  ;;  %v195_v54 = vmul.f32 %v194_v47, %v142_v38  ;;  %v197_v55 = vstv %s2018_s11  ;;  %v1519_v36 = vld [vmem:[%s2748_s4 + $0x10] sm:$0xff]  ;;  %s1490_s3 = sshll.u32 %s1849_s18, 4  ;;  %s1491_s3 = int_to_ptr.vmem [resolvable:$true] %s1490_s3 }
  0x28   :  { %s2038_s5 = sld [smem:[#allocation5 + $0xf]]  ;;  %v138_v56 = vsub.f32 1.0, %v137_v49  ;;  %v139_v57 = vsub.f32 %v123_v24, %v124_v25  ;;  %v183_v60 = vmul.f32 %v182_v53, %v135_v48  ;;  %v186_v61 = vstv %s2012_s19  ;;  %s2668_s19 = sshll.u32 %s1853_s16, 4  ;;  %s1466_s19 = int_to_ptr.vmem [resolvable:$true] %s2668_s19 }
  0x29   :  { %s2040_s26 = sld [smem:[#allocation5 + $0x10]]  ;;  %v176_v59 = vadd.f32 %v175_v51, %v172_v50  ;;  %v198_v62 = vmul.f32 %v197_v55, %v144_v39  ;;  %v201_v63 = vstv %s2020_s22  ;;  %v205_v0 = vstv %s2022_s1  ;;  %s1467_s11 = sshll.u32 %s2758_s14, 4  ;;  %s1468_s11 = int_to_ptr.hbm [resolvable:$true] %s1467_s11 }
  0x2a   :  { %s2044_s27 = sld [smem:[#allocation5 + $0x11]]  ;;  %v140_v2 = vmul.f32 2.0, %v139_v57  ;;  %v187_v5 = vmul.f32 %v186_v61, %v138_v56  ;;  %v202_v6 = vmul.f32 %v201_v63, %v147_v43  ;;  %v213_v17 = vstv %s2026_s23  ;;  %s1854_s14 = smov [#allocation16]  }
  0x2b   :  { %426 = vperm.xlu0 %1588, %v412_v7   ;;  %s2046_s8 = sld [smem:[#allocation5 + $0x12]]  ;;  %v180_v4 = vadd.f32 %v179_v52, %v176_v59  ;;  %v152_v7 = vld [vmem:[#allocation10 + $0x10] sm:$0xff]  ;;  %v217_v21 = vstv %s2028_s24  ;;  %v256_v61 = vlaneseq  ;;  %s2685_s22 = sshll.u32 %s1854_s14, 4  ;;  %s1480_s22 = int_to_ptr.vmem [resolvable:$true] %s2685_s22 }
  0x2c   :  { %385 = vperm.xlu1 %1589, %v379_v8   ;;  %421 = vperm.xlu2 %1590, %v411_v9   ;;  %s2051_s28 = sld [smem:[#allocation5 + $0x13]]  ;;  %v2055_v8 = vld [vmem:[#allocation10 + $0x18] sm:$0xff]  ;;  %v190_v9 = vstv %s2014_s20  ;;  %v214_v20 = vmul.f32 %v213_v17, %v152_v7  ;;  %v220_v25 = vstv %s2030_s2  ;;  %s1481_s4 = sshll.u32 %s2759_s15, 4  ;;  %s1482_s4 = int_to_ptr.hbm [resolvable:$true] %s1481_s4 }
  0x2d   :  { %s2053_s0 = sld [smem:[#allocation5 + $0x14]]  ;;  %v184_v15 = vadd.f32 %v183_v60, %v180_v4  ;;  %v191_v16 = vmul.f32 %v190_v9, %v140_v2  ;;  %v218_v24 = vmul.f32 %v217_v21, %v2055_v8  ;;  %v224_v26 = vstv %s2032_s25  ;;  %v259_v60 = vld [vmem:[#allocation12] sm:$0xff]  ;;  %s1855_s15 = smov [#allocation13]  }
  0x2e   :  { %v228_v31 = vstv %s2038_s5  ;;  %v260_v63 = vrot.slane %v259_v60, 7  ;;  %s1452_s23 = sshll.u32 %s1855_s15, 4  ;;  %s1454_s25 = sshll.u32 %s2757_s13, 4  ;;  %s1453_s23 = int_to_ptr.vmem [resolvable:$true] %s1452_s23  ;;  %s1455_s25 = int_to_ptr.hbm [resolvable:$true] %s1454_s25 }
  0x2f   :  { %v188_v23 = vadd.f32 %v187_v5, %v184_v15  ;;  %v232_v35 = vstv %s2040_s26  ;;  %v229_v39 = vmul.f32 %v228_v31, %v159_v22 }
  0x30   :  { %v236_v40 = vstv %s2044_s27  ;;  %v233_v42 = vmul.f32 %v1518_v27, %v232_v35 }
  0x31   :  { %v192_v34 = vadd.f32 %v191_v16, %v188_v23  ;;  %v240_v43 = vstv %s2046_s8  ;;  %v237_v51 = vmul.f32 %v1519_v36, %v236_v40 }
  0x32   :  { %v243_v44 = vstv %s2051_s28  ;;  %v241_v48 = vmul.f32 %v1520_v32, %v240_v43  ;;  %s2762_s28 = sld [smem:[#allocation25_spill]] }
  0x33   :  { %416 = vperm.xlu0 %1588, %v410_v10   ;;  %v199_v10 = vadd.f32 %v198_v62, %v195_v54  ;;  %v247_v45 = vstv %s2053_s0  ;;  %v244_v49 = vmul.f32 %v1521_v33, %v243_v44 }
  0x34   :  { %475 = vperm.xlu1 %1589, %v457_v11   ;;  %470 = vperm.xlu2 %1590, %v456_v12   ;;  %v206_v11 = vmul.f32 %v205_v0, %v148_v58  ;;  %v209_v12 = vstv %s2024_s6  ;;  %v248_v53 = vmul.f32 %v1522_v41, %v247_v45  ;;  %v2096_v0 = vshrl.u32 %v256_v61, 7 }
  0x35   :  { %v203_v18 = vadd.f32 %v202_v6, %v199_v10  ;;  %v210_v19 = vmul.f32 %v209_v12, %v150_v3  ;;  %v245_v52 = vadd.f32 %v244_v49, %v241_v48 }
  0x36   :  { %vm258_vm0 = vcmp.eq.s32.totalorder %v2096_v0, 0  ;;  %vm280_vm1 = vcmp.le.s32.totalorder %v2096_v0, 0  ;;  %vm292_vm2 = vcmp.le.s32.totalorder %v2096_v0, 1  ;;  %vm304_vm3 = vcmp.le.s32.totalorder %v2096_v0, 2 }
  0x37   :  { %v207_v28 = vadd.f32 %v206_v11, %v203_v18  ;;  %v249_v57 = vadd.f32 %v248_v53, %v245_v52  ;;  %vm316_vm4 = vcmp.le.s32.totalorder %v2096_v0, 3 }
  0x39   :  { %v211_v37 = vadd.f32 %v210_v19, %v207_v28 }
  0x3b   :  { %465 = vperm.xlu0 %1588, %v455_v13   ;;  %v2059_v13 = vld [vmem:[#allocation10 + $0x20] sm:$0xff]  ;;  %v215_v46 = vadd.f32 %v214_v20, %v211_v37 }
  0x3c   :  { %460 = vperm.xlu1 %1589, %v454_v14   ;;  %v2061_v14 = vld [vmem:[#allocation10 + $0x28] sm:$0xff]  ;;  %v221_v29 = vmul.f32 %v220_v25, %v2059_v13 }
  0x3d   :  { %v225_v30 = vmul.f32 %v224_v26, %v2061_v14  ;;  %v250_v55 = vadd.f32 %v215_v46, %v192_v34 }
  0x3e   :  { %v222_v38 = vadd.f32 %v221_v29, %v218_v24 }
  0x40   :  { %v226_v47 = vadd.f32 %v225_v30, %v222_v38 }
  0x42   :  { %v230_v50 = vadd.f32 %v229_v39, %v226_v47 }
  0x44   :  { %v234_v54 = vadd.f32 %v233_v42, %v230_v50 }
  0x46   :  { %v238_v56 = vadd.f32 %v237_v51, %v234_v54 }
  0x48   :  { %v251_v58 = vadd.f32 %v250_v55, %v238_v56 }
  0x4a   :  { %v252_v59 = vadd.f32 %v251_v58, %v249_v57 }
  0x4c   :  { %253 = vst [vmem:[#allocation2] sm:$0xff] %v252_v59 }
  0x53   :  { %v1591_v3 = vld [vmem:[#allocation2] ss:$0 sm:$0xff]  ;;  %v1592_v12 = vld [vmem:[#allocation2 + $0x1] ss:$0 sm:$0xff]  ;;  %v1593_v22 = vld [vmem:[#allocation2 + $0x2] ss:$0 sm:$0xff] }
  0x54   :  { %v1594_v30 = vld [vmem:[#allocation2 + $0x3] ss:$0 sm:$0xff]  ;;  %v1595_v38 = vld [vmem:[#allocation2 + $0x4] ss:$0 sm:$0xff]  ;;  %v1596_v48 = vld [vmem:[#allocation2 + $0x5] ss:$0 sm:$0xff] }
  0x76   :  { %v432_v43 = vpop.permute.xlu2 %431 }
  0x7e   :  { %v391_v49 = vpop.permute.xlu2 %390 }
  0x86   :  { %v422_v61 = vpop.permute.xlu2 %421 }
  0x8d   :  { %v2094_v62 = vpop.permute.xlu0 %263 }
  0x8e   :  { %v266_v2 = vmul.f32 %v2094_v62, %v260_v63  ;;  %v401_v40 = vpop.permute.xlu1 %400 }
  0x90   :  { %v271_v6 = vsel %vm258_vm0, %v1591_v3, %v266_v2 }
  0x95   :  { %v2100_v4 = vpop.permute.xlu0 %274 }
  0x96   :  { %v277_v5 = vmul.f32 %v2100_v4, %v259_v60  ;;  %v396_v45 = vpop.permute.xlu1 %395 }
  0x98   :  { %v278_v7 = vadd.f32 %v277_v5, %v271_v6 }
  0x9a   :  { %1600 = vtanh.f32 %v278_v7 }
  0x9d   :  { %v427_v51 = vpop.permute.xlu0 %426 }
  0x9e   :  { %v386_v56 = vpop.permute.xlu1 %385 }
  0xa0   :  { %v1601_v9 = vpop.eup %1600 }
  0xa1   :  { %v283_v10 = vsel %vm280_vm1, %v1601_v9, %v259_v60 }
  0xa2   :  { %v284_v11 = vrot.slane %v283_v10, 7  ;;  %v289_v16 = vmul.f32 %v283_v10, %v2100_v4 }
  0xa4   :  { %v285_v15 = vmul.f32 %v284_v11, %v2094_v62 }
  0xa5   :  { %v417_v5 = vpop.permute.xlu0 %416 }
  0xa6   :  { %v288_v17 = vsel %vm258_vm0, %v1592_v12, %v285_v15 }
  0xa7   :  { %v290_v18 = vadd.f32 %v289_v16, %v288_v17  ;;  %v1598_v16 = vld [vmem:[#allocation2 + $0x6] ss:$0 sm:$0xff] }
  0xa9   :  { %1602 = vtanh.f32 %v290_v18 }
  0xaf   :  { %v1603_v19 = vpop.eup %1602 }
  0xb0   :  { %v295_v20 = vsel %vm292_vm2, %v1603_v19, %v283_v10 }
  0xb1   :  { %v296_v21 = vrot.slane %v295_v20, 7  ;;  %v301_v24 = vmul.f32 %v295_v20, %v2100_v4 }
  0xb3   :  { %v297_v23 = vmul.f32 %v296_v21, %v2094_v62 }
  0xb5   :  { %v300_v25 = vsel %vm258_vm0, %v1593_v22, %v297_v23  ;;  %v450_v23 = vld [vmem:[%s2754_s10] sm:$0xff] }
  0xb6   :  { %v302_v26 = vadd.f32 %v301_v24, %v300_v25 }
  0xb8   :  { %1604 = vtanh.f32 %v302_v26  ;;  %v451_v26 = vld [vmem:[%s2754_s10 + $0x8] sm:$0xff] }
  0xbe   :  { %v1605_v27 = vpop.eup %1604 }
  0xbf   :  { %v307_v28 = vsel %vm304_vm3, %v1605_v27, %v295_v20  ;;  %v452_v27 = vld [vmem:[%s2754_s10 + $0x10] sm:$0xff] }
  0xc0   :  { %v308_v29 = vrot.slane %v307_v28, 7  ;;  %v313_v32 = vmul.f32 %v307_v28, %v2100_v4 }
  0xc2   :  { %v309_v31 = vmul.f32 %v308_v29, %v2094_v62  ;;  %v453_v29 = vld [vmem:[%s2754_s10 + $0x18] sm:$0xff] }
  0xc4   :  { %v312_v33 = vsel %vm258_vm0, %v1594_v30, %v309_v31  ;;  %v1599_v31 = vld [vmem:[#allocation2 + $0x7] ss:$0 sm:$0xff] }
  0xc5   :  { %v314_v34 = vadd.f32 %v313_v32, %v312_v33 }
  0xc7   :  { %1606 = vtanh.f32 %v314_v34 }
  0xcd   :  { %v1607_v35 = vpop.eup %1606 }
  0xce   :  { %v319_v36 = vsel %vm316_vm4, %v1607_v35, %v307_v28 }
  0xcf   :  { %v320_v37 = vrot.slane %v319_v36, 7  ;;  %v325_v41 = vmul.f32 %v319_v36, %v2100_v4 }
  0xd1   :  { %v321_v39 = vmul.f32 %v320_v37, %v2094_v62 }
  0xd3   :  { %v324_v42 = vsel %vm258_vm0, %v1595_v38, %v321_v39 }
  0xd4   :  { %v326_v44 = vadd.f32 %v325_v41, %v324_v42 }
  0xd6   :  { %1608 = vtanh.f32 %v326_v44 }
  0xdc   :  { %v1609_v46 = vpop.eup %1608 }
  0xdd   :  { %v329_v47 = vrot.slane %v1609_v46, 7  ;;  %328 = vst [vmem:[#allocation3 - $0x4] sm:$0x10] %v1609_v46  ;;  %v334_v52 = vmul.f32 %v1609_v46, %v2100_v4 }
  0xdf   :  { %v330_v50 = vmul.f32 %v329_v47, %v2094_v62 }
  0xe1   :  { %v333_v53 = vsel %vm258_vm0, %v1596_v48, %v330_v50 }
  0xe2   :  { %v335_v54 = vadd.f32 %v334_v52, %v333_v53 }
  0xe4   :  { %1610 = vtanh.f32 %v335_v54  ;;  %v1597_v55 = vld [vmem:[#allocation3] ss:$0 sm:$0xff] }
  0xe5   :  { %v409_v57 = vmul.f32 %v1597_v55, %v401_v40  ;;  %v408_v58 = vmul.f32 %v1597_v55, %v396_v45  ;;  %v407_v59 = vmul.f32 %v1597_v55, %v391_v49  ;;  %v406_v60 = vmul.f32 %v1597_v55, %v386_v56 }
  0xe6   :  { %v2164_v56 = vstv %s2762_s28 }
  0xe7   :  { %v437_v63 = vadd.f32 %v432_v43, %v409_v57  ;;  %v436_v2 = vadd.f32 %v427_v51, %v408_v58  ;;  %v435_v3 = vadd.f32 %v422_v61, %v407_v59  ;;  %v434_v9 = vadd.f32 %v417_v5, %v406_v60 }
  0xe8   :  { %v2168_v57 = vmul.f32 %v2164_v56, %v2055_v8  ;;  %v2172_v58 = vmul.f32 %v2164_v56, %v2059_v13 }
  0xe9   :  { %v445_v7 = vmul.f32 0.1, %v437_v63  ;;  %vm441_vm5 = vcmp.ge.f32.partialorder %v437_v63, 0.0  ;;  %vm440_vm6 = vcmp.ge.f32.partialorder %v436_v2, 0.0  ;;  %v444_v10 = vmul.f32 0.1, %v436_v2 }
  0xea   :  { %v1611_v6 = vpop.eup %1610  ;;  %v443_v11 = vmul.f32 0.1, %v435_v3  ;;  %vm439_vm7 = vcmp.ge.f32.partialorder %v435_v3, 0.0  ;;  %v442_v18 = vmul.f32 0.1, %v434_v9  ;;  %vm438_vm8 = vcmp.ge.f32.partialorder %v434_v9, 0.0 }
  0xeb   :  { %v449_v12 = vsel %vm441_vm5, %v437_v63, %v445_v7  ;;  %v337_v15 = vrot.slane %v1611_v6, 7  ;;  %v448_v17 = vsel %vm440_vm6, %v436_v2, %v444_v10  ;;  %v342_v20 = vmul.f32 %v1611_v6, %v2100_v4 }
  0xec   :  { %503 = vmatpush.msra.mxu0 %v449_v12  ;;  %1560 = vmatpush.msra.mxu2 %v449_v12  ;;  %v447_v21 = vsel %vm439_vm7, %v435_v3, %v443_v11  ;;  %v446_v25 = vsel %vm438_vm8, %v434_v9, %v442_v18  ;;  %v572_v59 = vmul.f32 %v2172_v58, %v2172_v58  ;;  %v471_v9 = vpop.permute.xlu2 %470 }
  0xed   :  { %1561 = vmatpush.msra.mxu3 %v449_v12  ;;  %v338_v19 = vmul.f32 %v337_v15, %v2094_v62  ;;  %v466_v12 = vpop.permute.xlu0 %465 }
  0xee   :  { %504 = vmatpush.msra.mxu0 %v448_v17  ;;  %1562 = vmatpush.msra.mxu2 %v448_v17 }
  0xef   :  { %1563 = vmatpush.msra.mxu3 %v448_v17  ;;  %v341_v22 = vsel %vm258_vm0, %v1598_v16, %v338_v19 }
  0xf0   :  { %505 = vmatpush.msra.mxu0 %v447_v21  ;;  %1564 = vmatpush.msra.mxu2 %v447_v21  ;;  %v343_v24 = vadd.f32 %v342_v20, %v341_v22 }
  0xf1   :  { %1565 = vmatpush.msra.mxu3 %v447_v21 }
  0xf2   :  { %506 = vmatpush.msra.mxu0 %v446_v25  ;;  %1566 = vmatpush.msra.mxu2 %v446_v25  ;;  %1612 = vtanh.f32 %v343_v24 }
  0xf3   :  { %1567 = vmatpush.msra.mxu3 %v446_v25  ;;  %1543 = vmatmul.msk.f32.vlgmr.msra.gmra.mxu0 %vm478_vm9, %v450_v23 }
  0xf4   :  { %1544 = vmatmul.msk.f32.vlgmr.msra.gmra.mxu2 %vm478_vm9, %v451_v26  ;;  %1545 = vmatmul.msk.f32.vlgmr.msra.gmra.mxu3 %vm478_vm9, %v452_v27 }
  0xf8   :  { %v1613_v28 = vpop.eup %1612 }
  0xf9   :  { %v345_v30 = vrot.slane %v1613_v28, 7  ;;  %v350_v33 = vmul.f32 %v1613_v28, %v2100_v4 }
  0xfb   :  { %v346_v32 = vmul.f32 %v345_v30, %v2094_v62 }
  0xfc   :  { %1546 = vmatmul.msk.f32.gmra.mxu3 %vm478_vm9, %v453_v29 }
  0xfd   :  { %v349_v34 = vsel %vm258_vm0, %v1599_v31, %v346_v32 }
  0xfe   :  { %v351_v35 = vadd.f32 %v350_v33, %v349_v34 }
 0x100   :  { %1614 = vtanh.f32 %v351_v35 }
 0x106   :  { %v1615_v36 = vpop.eup %1614 }
 0x107   :  { %353 = vst [vmem:[#allocation17] sm:$0x1] %v1615_v36  ;;  %v354_v37 = vrot.slane %v1615_v36, 7  ;;  %v356_v39 = vmul.f32 %v1615_v36, %v2100_v4 }
 0x109   :  { %v355_v38 = vmul.f32 %v354_v37, %v2094_v62 }
 0x10b   :  { %v357_v40 = vadd.f32 %v356_v39, %v355_v38  ;;  %v532_v38 = vld [vmem:[%s2756_s12] sm:$0x3f] }
 0x10d   :  { %1616 = vtanh.f32 %v357_v40 }
 0x113   :  { %v1617_v41 = vpop.eup %1616 }
 0x114   :  { %359 = vst [vmem:[#allocation17] sm:$0x2] %v1617_v41  ;;  %v360_v42 = vrot.slane %v1617_v41, 7  ;;  %v362_v44 = vmul.f32 %v1617_v41, %v2100_v4 }
 0x116   :  { %v361_v43 = vmul.f32 %v360_v42, %v2094_v62 }
 0x118   :  { %v363_v0 = vadd.f32 %v362_v44, %v361_v43 }
 0x11a   :  { %1618 = vtanh.f32 %v363_v0 }
 0x120   :  { %v1619_v45 = vpop.eup %1618 }
 0x121   :  { %365 = vst [vmem:[#allocation17] sm:$0x4] %v1619_v45  ;;  %v366_v46 = vrot.slane %v1619_v45, 7  ;;  %v368_v48 = vmul.f32 %v1619_v45, %v2100_v4 }
 0x123   :  { %v367_v47 = vmul.f32 %v366_v46, %v2094_v62 }
 0x125   :  { %v369_v49 = vadd.f32 %v368_v48, %v367_v47 }
 0x127   :  { %1620 = vtanh.f32 %v369_v49 }
 0x12d   :  { %v1621_v50 = vpop.eup %1620 }
 0x12e   :  { %371 = vst [vmem:[#allocation17] sm:$0x8] %v1621_v50  ;;  %v372_v51 = vrot.slane %v1621_v50, 7  ;;  %v374_v53 = vmul.f32 %v1621_v50, %v2100_v4  ;;  %v571_v4 = vmul.f32 %v2168_v57, %v2168_v57  ;;  %v1843_v50 = vmov 683565275  }
 0x130   :  { %v373_v52 = vmul.f32 %v372_v51, %v2094_v62  ;;  %v2176_v62 = vmul.f32 %v2164_v56, %v2061_v14  ;;  %v573_v60 = vadd.f32 %v572_v59, %v571_v4  ;;  %v476_v14 = vpop.permute.xlu1 %475 }
 0x132   :  { %v375_v54 = vadd.f32 %v374_v53, %v373_v52  ;;  %v574_v61 = vmul.f32 %v2176_v62, %v2176_v62  ;;  %v1844_v52 = vmov 2102212464  }
 0x134   :  { %1622 = vtanh.f32 %v375_v54  ;;  %v2184_v8 = vadd.f32 %v574_v61, %v573_v60  ;;  %v1846_v60 = vmov 2131351028  }
 0x136   :  { %1624 = vrsqrt.f32 %v2184_v8  ;;  %vm583_vm10 = vcmp.eq.f32.partialorder %v2184_v8, inf  ;;  %v586_v16 = vand.u32 2147483648, %v2184_v8  ;;  %vm585_vm11 = vcmp.eq.f32.partialorder %v2184_v8, 0.0 }
 0x138   :  { %v461_v23 = vpop.permute.xlu1 %460 }
 0x13a   :  { %v1623_v55 = vpop.eup %1622 }
 0x13b   :  { %377 = vst [vmem:[#allocation17] sm:$0x10] %v1623_v55  ;;  %v1845_v55 = vmov 2475754826  }
 0x13c   :  { %v1625_v13 = vpop.eup %1624  ;;  %1495 = dma.vmem_to_hbm [thread:$0]  %s1491_s3, 128, %s1493_s17, [#allocation18]  }
 0x13d   :  { %v577_v63 = vmul.f32 %v1625_v13, %v2184_v8 }
 0x13f   :  { %v578_v2 = vmul.f32 %v1625_v13, %v577_v63 }
 0x141   :  { %v579_v5 = vmul.f32 0.5, %v578_v2 }
 0x143   :  { %v580_v6 = vsub.f32 1.5, %v579_v5  ;;  %v1847_v5 = vmov 920167782  }
 0x145   :  { %v581_v7 = vmul.f32 %v1625_v13, %v580_v6 }
 0x147   :  { %v582_v11 = vmul.f32 %v581_v7, %v2184_v8 }
 0x149   :  { %v584_v19 = vsel %vm583_vm10, %v2184_v8, %v582_v11 }
 0x14a   :  { %v2193_v22 = vsel %vm585_vm11, %v586_v16, %v584_v19 }
 0x14b   :  { %v941_v24 = vand.u32 2139095040, %v2193_v22  ;;  %v2197_v31 = vmul.f32 0.5, %v2193_v22  ;;  %v938_v0 = vand.u32 2147483647, %v2193_v22 }
 0x14d   :  { %v942_v28 = vshrl.u32 %v941_v24, 23  ;;  %v604_v35 = vand.u32 2139095040, %v2197_v31  ;;  %v2209_v48 = vand.u32 8388607, %v938_v0  ;;  %v601_v13 = vand.u32 2147483647, %v2197_v31 }
 0x14f   :  { %v1554_v32 = vadd.s32 4294967169, %v942_v28  ;;  %v605_v39 = vshrl.u32 %v604_v35, 23  ;;  %v946_v63 = vor.u32 8388608, %v2209_v48 }
 0x151   :  { %v948_v36 = vadd.s32 1, %v1554_v32  ;;  %v1548_v42 = vadd.s32 4294967169, %v605_v39 }
 0x153   :  { %vm949_vm0 = vcmp.gt.s32.totalorder %v948_v36, 0  ;;  %v611_v44 = vadd.s32 1, %v1548_v42 }
 0x154   :  { %v950_v41 = vsel %vm949_vm0, %v948_v36, 0 }
 0x155   :  { %v952_v43 = vand.u32 31, %v950_v41  ;;  %vm612_vm1 = vcmp.gt.s32.totalorder %v611_v44, 0  ;;  %v2211_v49 = vshrl.u32 %v950_v41, 5 }
 0x156   :  { %v613_v46 = vsel %vm612_vm1, %v611_v44, 0 }
 0x157   :  { %v2205_v45 = vsub.s32 32, %v952_v43  ;;  %v615_v47 = vand.u32 31, %v613_v46  ;;  %v955_v51 = vshll.u32 %v1843_v50, %v952_v43  ;;  %v964_v53 = vshll.u32 %v1844_v52, %v952_v43 }
 0x158   :  { %v958_v59 = vshll.u32 %v1845_v55, %v952_v43  ;;  %v961_v2 = vshll.u32 %v1846_v60, %v952_v43  ;;  %v2227_v11 = vshrl.u32 %v613_v46, 5  ;;  %vm970_vm6 = vcmp.lt.s32.totalorder %v2211_v49, 1 }
 0x159   :  { %v2214_v54 = vsub.s32 32, %v615_v47  ;;  %v956_v4 = vshrl.u32 %v1845_v55, %v2205_v45  ;;  %v959_v61 = vshrl.u32 %v1846_v60, %v2205_v45  ;;  %v965_v7 = vshrl.u32 %v1847_v5, %v2205_v45 }
 0x15a   :  { %v621_v16 = vshll.u32 %v1845_v55, %v615_v47  ;;  %v630_v24 = vshll.u32 %v1847_v5, %v615_v47  ;;  %vm633_vm2 = vcmp.lt.s32.totalorder %v2227_v11, 1  ;;  %vm634_vm3 = vcmp.lt.s32.totalorder %v2227_v11, 2 }
 0x15b   :  { %v628_v6 = vshrl.u32 %v1847_v5, %v2214_v54  ;;  %v625_v19 = vshrl.u32 %v1844_v52, %v2214_v54  ;;  %vm635_vm4 = vcmp.lt.s32.totalorder %v2227_v11, 3  ;;  %vm636_vm5 = vcmp.lt.s32.totalorder %v2227_v11, 4 }
 0x15c   :  { %v2267_v41 = vor.u32 %v959_v61, %v958_v59  ;;  %vm973_vm7 = vcmp.lt.s32.totalorder %v2211_v49, 4  ;;  %vm971_vm8 = vcmp.lt.s32.totalorder %v2211_v49, 2 }
 0x170   :  { %v508_v17 = vpop.f32.mrf.mxu0 }
 0x171   :  { %v509_v25 = vadd.f32 %v508_v17, %v461_v23  ;;  %v622_v17 = vshrl.u32 %v1846_v60, %v2214_v54 }
 0x173   :  { %v524_v34 = vmul.f32 0.1, %v509_v25  ;;  %vm520_vm15 = vcmp.ge.f32.partialorder %v509_v25, 0.0 }
 0x175   :  { %v528_v40 = vsel %vm520_vm15, %v509_v25, %v524_v34  ;;  %v2235_v25 = vor.u32 %v622_v17, %v621_v16 }
 0x177   :  { %v514_v3 = vpop.f32.mrf.mxu3  ;;  %v511_v10 = vpop.f32.mrf.mxu2 }
 0x178   :  { %v515_v15 = vadd.f32 %v514_v3, %v471_v9  ;;  %v512_v20 = vadd.f32 %v511_v10, %v466_v12  ;;  %v627_v3 = vshll.u32 %v1844_v52, %v615_v47  ;;  %v2223_v9 = vshll.u32 %v1847_v5, %v952_v43 }
 0x179   :  { %v608_v10 = vand.u32 8388607, %v601_v13  ;;  %v618_v12 = vshll.u32 %v1843_v50, %v615_v47 }
 0x17a   :  { %v526_v27 = vmul.f32 0.1, %v515_v15  ;;  %vm522_vm13 = vcmp.ge.f32.partialorder %v515_v15, 0.0  ;;  %v525_v30 = vmul.f32 0.1, %v512_v20  ;;  %vm521_vm14 = vcmp.ge.f32.partialorder %v512_v20, 0.0 }
 0x17b   :  { %v629_v23 = vor.u32 %v628_v6, %v627_v3 }
 0x17c   :  { %v530_v33 = vsel %vm522_vm13, %v515_v15, %v526_v27  ;;  %v529_v37 = vsel %vm521_vm14, %v512_v20, %v525_v30  ;;  %v619_v15 = vshrl.u32 %v1845_v55, %v2214_v54  ;;  %v609_v20 = vor.u32 8388608, %v608_v10 }
 0x17d   :  { %v1848_v27 = vmov 1326507024  }
 0x17e   :  { %v631_v28 = vshrl.u32 %v1848_v27, %v2214_v54  ;;  %v968_v34 = vshrl.u32 %v1848_v27, %v2205_v45 }
 0x17f   :  { %v517_v18 = vpop.f32.mrf.mxu3 }
 0x180   :  { %v518_v21 = vadd.f32 %v517_v18, %v476_v14  ;;  %v962_v14 = vshrl.u32 %v1844_v52, %v2205_v45  ;;  %v624_v18 = vshll.u32 %v1846_v60, %v615_v47  ;;  %v632_v30 = vor.u32 %v631_v28, %v630_v24 }
 0x181   :  { %v966_v52 = vor.u32 %v965_v7, %v964_v53  ;;  %v969_v55 = vor.u32 %v968_v34, %v2223_v9  ;;  %v617_v34 = vshrl.u32 %v1843_v50, %v2214_v54 }
 0x182   :  { %vm523_vm12 = vcmp.ge.f32.partialorder %v518_v21, 0.0  ;;  %v527_v26 = vmul.f32 0.1, %v518_v21  ;;  %v2269_v42 = vor.u32 %v962_v14, %v961_v2 }
 0x183   :  { %v979_v10 = vsel %vm973_vm7, %v966_v52, 920167782 }
 0x184   :  { %v531_v29 = vsel %vm523_vm12, %v518_v21, %v527_v26  ;;  %v2233_v21 = vor.u32 %v619_v15, %v618_v12  ;;  %v2237_v26 = vor.u32 %v625_v19, %v624_v18  ;;  %v982_v17 = vsel %vm970_vm6, %v2267_v41, %v2269_v42 }
 0x185   :  { %548 = vmatpush.msra.mxu1 %v531_v29  ;;  %v2244_v29 = vshll.u32 %v609_v20, 8  ;;  %v983_v19 = vsel %vm973_vm7, %v969_v55, 1326507024  ;;  %v2295_v20 = vshll.u32 %v946_v63, 8 }
 0x186   :  { %v641_v32 = vsel %vm633_vm2, %v2233_v21, %v2235_v25  ;;  %v645_v36 = vsel %vm633_vm2, %v2235_v25, %v2237_v26 }
 0x187   :  { %549 = vmatpush.msra.mxu1 %v530_v33  ;;  %v642_v33 = vsel %vm636_vm5, %v629_v23, 920167782  ;;  %v651_v44 = vshrl.u32 %v2244_v29, 16 }
 0x188   :  { %v643_v35 = vsel %vm635_vm4, %v2237_v26, %v642_v33 }
 0x189   :  { %550 = vmatpush.msra.mxu1 %v529_v37  ;;  %v650_v37 = vand.u32 65535, %v2244_v29  ;;  %v644_v39 = vsel %vm634_vm3, %v641_v32, %v643_v35 }
 0x18a   :  { %v674_v46 = vand.u32 65535, %v644_v39  ;;  %v675_v47 = vshrl.u32 %v644_v39, 16  ;;  %v638_v39 = vsel %vm636_vm5, %v2237_v26, 2102212464 }
 0x18b   :  { %551 = vmatpush.msra.mxu1 %v528_v40  ;;  %v646_v40 = vsel %vm636_vm5, %v632_v30, 1326507024  ;;  %v639_v54 = vsel %vm635_vm4, %v2235_v25, %v638_v39  ;;  %v988_v25 = vshrl.u32 %v2295_v20, 16 }
 0x18c   :  { %1547 = vmatmul.msk.f32.vlgmr.msra.gmra.mxu1 %vm478_vm9, %v532_v38  ;;  %v2261_v38 = vor.u32 %v956_v4, %v955_v51  ;;  %v647_v43 = vsel %vm635_vm4, %v629_v23, %v646_v40  ;;  %v677_v60 = vmul.u32 %v675_v47, %v650_v37  ;;  %v676_v61 = vmul.u32 %v674_v46, %v650_v37 }
 0x18d   :  { %v648_v51 = vsel %vm634_vm3, %v645_v36, %v647_v43  ;;  %v678_v2 = vmul.u32 %v674_v46, %v651_v44  ;;  %vm972_vm9 = vcmp.lt.s32.totalorder %v2211_v49, 3  ;;  %v679_v6 = vmul.u32 %v675_v47, %v651_v44 }
 0x18e   :  { %v652_v4 = vand.u32 65535, %v648_v51  ;;  %v653_v59 = vshrl.u32 %v648_v51, 16  ;;  %v978_v53 = vsel %vm970_vm6, %v2261_v38, %v2267_v41  ;;  %v680_v7 = vshll.u32 %v677_v60, 16 }
 0x18f   :  { %v682_v9 = vshll.u32 %v678_v2, 16  ;;  %v980_v27 = vsel %vm972_vm9, %v2269_v42, %v979_v10  ;;  %v681_v30 = vshrl.u32 %v677_v60, 16  ;;  %v683_v36 = vshrl.u32 %v678_v2, 16 }
 0x190   :  { %v654_v14 = vmul.u32 %v652_v4, %v650_v37  ;;  %v655_v3 = vmul.u32 %v653_v59, %v650_v37  ;;  %v656_v5 = vmul.u32 %v652_v4, %v651_v44  ;;  %v657_v12 = vmul.u32 %v653_v59, %v651_v44 }
 0x191   :  { %vm684_vm10 = vc.u32 %v676_v61, %v680_v7  ;;  %v686_v18 = vadd.s32 %v680_v7, %v676_v61  ;;  %v981_v44 = vsel %vm971_vm8, %v978_v53, %v980_v27  ;;  %v637_v46 = vsel %vm633_vm2, %v617_v34, %v2233_v21 }
 0x192   :  { %v658_v15 = vshll.u32 %v655_v3, 16  ;;  %v660_v16 = vshll.u32 %v656_v5, 16  ;;  %v685_v24 = vsel %vm684_vm10, 1, %v1842_v1  ;;  %v659_v48 = vshrl.u32 %v655_v3, 16 }
 0x193   :  { %v687_v32 = vadd.s32 %v685_v24, %v679_v6  ;;  %vm688_vm12 = vc.u32 %v686_v18, %v682_v9  ;;  %v661_v40 = vshrl.u32 %v656_v5, 16  ;;  %v2320_v47 = vadd.s32 %v686_v18, %v682_v9 }
 0x194   :  { %vm662_vm11 = vc.u32 %v654_v14, %v658_v15  ;;  %v664_v23 = vadd.s32 %v658_v15, %v654_v14  ;;  %v689_v33 = vsel %vm688_vm12, 1, %v1842_v1  ;;  %v640_v26 = vsel %vm634_vm3, %v637_v46, %v639_v54 }
 0x195   :  { %v663_v28 = vsel %vm662_vm11, 1, %v1842_v1  ;;  %v691_v37 = vadd.s32 %v689_v33, %v687_v32  ;;  %v984_v4 = vsel %vm972_vm9, %v966_v52, %v983_v19  ;;  %v987_v59 = vand.u32 65535, %v2295_v20 }
 0x196   :  { %v665_v63 = vadd.s32 %v663_v28, %v657_v12  ;;  %vm666_vm13 = vc.u32 %v664_v23, %v660_v16  ;;  %v694_v61 = vmul.u32 %v2244_v29, %v640_v26  ;;  %v985_v21 = vsel %vm971_vm8, %v982_v17, %v984_v4 }
 0x197   :  { %v667_v35 = vsel %vm666_vm13, 1, %v1842_v1  ;;  %v692_v51 = vadd.s32 %v691_v37, %v681_v30  ;;  %v989_v14 = vand.u32 65535, %v985_v21  ;;  %v990_v3 = vshrl.u32 %v985_v21, 16 }
 0x198   :  { %v669_v43 = vadd.s32 %v667_v35, %v665_v63  ;;  %v1011_v11 = vand.u32 65535, %v981_v44  ;;  %v1012_v53 = vshrl.u32 %v981_v44, 16  ;;  %v954_v27 = vshrl.u32 %v1843_v50, %v2205_v45 }
 0x199   :  { %v693_v60 = vadd.s32 %v692_v51, %v683_v36  ;;  %v991_v52 = vmul.u32 %v989_v14, %v987_v59  ;;  %v992_v6 = vmul.u32 %v990_v3, %v987_v59  ;;  %v993_v7 = vmul.u32 %v989_v14, %v988_v25 }
 0x19a   :  { %v670_v55 = vadd.s32 %v669_v43, %v659_v48  ;;  %v1013_v29 = vmul.u32 %v1011_v11, %v987_v59  ;;  %v1014_v10 = vmul.u32 %v1012_v53, %v987_v59  ;;  %v994_v15 = vmul.u32 %v990_v3, %v988_v25 }
 0x19b   :  { %v697_v5 = vadd.s32 1, %v693_v60  ;;  %v995_v16 = vshll.u32 %v992_v6, 16  ;;  %v997_v17 = vshll.u32 %v993_v7, 16  ;;  %v1015_v18 = vmul.u32 %v1011_v11, %v988_v25 }
 0x19c   :  { %v2331_v2 = vadd.s32 %v670_v55, %v661_v40  ;;  %v1016_v19 = vmul.u32 %v1012_v53, %v988_v25  ;;  %v1017_v23 = vshll.u32 %v1014_v10, 16  ;;  %v996_v30 = vshrl.u32 %v992_v6, 16 }
 0x19d   :  { %vm999_vm15 = vc.u32 %v991_v52, %v995_v16  ;;  %v1001_v28 = vadd.s32 %v995_v16, %v991_v52  ;;  %v1019_v48 = vshll.u32 %v1015_v18, 16  ;;  %v975_v35 = vsel %vm973_vm7, %v2269_v42, 2102212464 }
 0x19e   :  { %vm696_vm14 = vc.u32 %v2331_v2, %v2320_v47  ;;  %v1000_v32 = vsel %vm999_vm15, 1, %v1842_v1  ;;  %vm1021_vm0 = vc.u32 %v1013_v29, %v1017_v23  ;;  %v1023_v45 = vadd.s32 %v1017_v23, %v1013_v29 }
 0x19f   :  { %v698_v9 = vsel %vm696_vm14, %v697_v5, %v693_v60  ;;  %v1002_v33 = vadd.s32 %v1000_v32, %v994_v15  ;;  %vm1003_vm1 = vc.u32 %v1001_v28, %v997_v17  ;;  %v1022_v34 = vsel %vm1021_vm0, 1, %v1842_v1 }
 0x1a0   :  { %v699_v12 = vadd.s32 %v698_v9, %v694_v61  ;;  %v1004_v36 = vsel %vm1003_vm1, 1, %v1842_v1  ;;  %v1024_v50 = vadd.s32 %v1022_v34, %v1016_v19  ;;  %v998_v39 = vshrl.u32 %v993_v7, 16 }
 0x1a1   :  { %v1006_v40 = vadd.s32 %v1004_v36, %v1002_v33  ;;  %v974_v43 = vsel %vm970_vm6, %v954_v27, %v2261_v38  ;;  %v1018_v44 = vshrl.u32 %v1014_v10, 16  ;;  %vm1025_vm2 = vc.u32 %v1023_v45, %v1019_v48 }
 0x1a2   :  { %v700_v24 = vadd.s32 536870912, %v699_v12  ;;  %v976_v54 = vsel %vm972_vm9, %v2267_v41, %v975_v35  ;;  %v1026_v51 = vsel %vm1025_vm2, 1, %v1842_v1  ;;  %v1020_v26 = vshrl.u32 %v1015_v18, 16 }
 0x1a3   :  { %v1007_v42 = vadd.s32 %v1006_v40, %v996_v30  ;;  %v1028_v55 = vadd.s32 %v1026_v51, %v1024_v50  ;;  %v1027_v60 = vadd.s32 %v1023_v45, %v1019_v48  ;;  %v977_v61 = vsel %vm971_vm8, %v974_v43, %v976_v54 }
 0x1a4   :  { %v2338_v63 = vshrl.u32 %v700_v24, 30  ;;  %v1031_v3 = vmul.u32 %v2295_v20, %v977_v61  ;;  %v695_v5 = vadd.s32 %v2320_v47, %v2331_v2  ;;  %vm603_vm7 = vcmp.lt.s32.totalorder %v2197_v31, 0 }
 0x1a5   :  { %v1008_v59 = vadd.s32 %v1007_v42, %v998_v39  ;;  %v1029_v38 = vadd.s32 %v1028_v55, %v1018_v44  ;;  %vm2369_vm8 = vcmp.le.f32.partialorder %v601_v13, 0.7853982  ;;  %v1850_v30 = vmov 24.0  }
 0x1a6   :  { %v702_v37 = vshll.u32 %v2338_v63, 30  ;;  %1626 = vrcp.f32 %v1850_v30  ;;  %vm588_vm9 = vcmp.lt.f32.partialorder %v2193_v22, 1e-06  ;;  %v1851_v35 = vmov 48.0  }
 0x1a7   :  { %v1030_v14 = vadd.s32 %v1029_v38, %v1020_v26  ;;  %vm1033_vm4 = vc.u32 %v1008_v59, %v1027_v60  ;;  %v2382_v13 = vsel %vm588_vm9, 1.0, %v2193_v22  ;;  %1628 = vrcp.f32 %v1851_v35 }
 0x1a8   :  { %v703_v46 = vsub.s32 %v699_v12, %v702_v37  ;;  %1630 = vrcp.f32 %v2382_v13  ;;  %v1032_v42 = vadd.s32 %v1027_v60, %v1008_v59  ;;  %vm744_vm0 = vweird.f32 %v2197_v31 }
 0x1a9   :  { %v1034_v11 = vadd.s32 1, %v1030_v14  ;;  %vm761_vm1 = vweird.f32 %v2382_v13 }
 0x1aa   :  { %vm704_vm3 = vcmp.lt.s32.totalorder %v703_v46, 0  ;;  %v705_v4 = vsub.s32 0, %v703_v46 }
 0x1ab   :  { %v1035_v1 = vsel %vm1033_vm4, %v1034_v11, %v1030_v14 }
 0x1ac   :  { %v706_v21 = vsel %vm704_vm3, %v705_v4, %v703_v46  ;;  %v1036_v52 = vadd.s32 %v1035_v1, %v1031_v3  ;;  %v2385_v45 = vpop.eup %1626  ;;  %v725_v4 = vsub.s32 4, %v2338_v63 }
 0x1ad   :  { %v707_v25 = vclz %v706_v21  ;;  %v930_v40 = vmul.f32 24.0, %v2385_v45  ;;  %v1629_v55 = vpop.eup %1628  ;;  %vm934_vm11 = vweird.f32 %v2385_v45 }
 0x1ae   :  { %v1037_v9 = vadd.s32 536870912, %v1036_v52  ;;  %v1631_v21 = vpop.eup %1630  ;;  %v593_v14 = vmul.f32 48.0, %v1629_v55  ;;  %v726_v59 = vsel %vm603_vm7, %v725_v4, %v2338_v63  ;;  %vm597_vm12 = vweird.f32 %v1629_v55  ;;  %v2425_v4 = vld [vmem:[#allocation10] sm:$0xff] }
 0x1af   :  { %v1549_v41 = vadd.s32 4294967294, %v707_v25  ;;  %v931_v54 = vsub.f32 1.0, %v930_v40  ;;  %v2396_v25 = vsel %vm588_vm9, 1.0, %v2184_v8  ;;  %v757_v11 = vmul.f32 %v1631_v21, %v2382_v13 }
 0x1b0   :  { %v2358_v12 = vshrl.u32 %v1037_v9, 30  ;;  %v594_v1 = vsub.f32 1.0, %v593_v14  ;;  %1632 = vrcp.f32 %v2396_v25  ;;  %vm762_vm2 = vweird.f32 %v1631_v21  ;;  %v2439_v14 = vld [vmem:[#allocation10 + $0x8] sm:$0xff] }
 0x1b1   :  { %vm1550_vm5 = vcmp.lt.s32.totalorder %v1549_v41, 0  ;;  %v932_v3 = vmul.f32 %v2385_v45, %v931_v54  ;;  %v758_v9 = vsub.f32 1.0, %v757_v11  ;;  %vm763_vm3 = vmor %vm761_vm1, %vm762_vm2 }
 0x1b2   :  { %v710_v53 = vsel %vm1550_vm5, 0, %v1549_v41  ;;  %v1039_v16 = vshll.u32 %v2358_v12, 30 }
 0x1b3   :  { %v711_v6 = vsub.s32 32, %v710_v53  ;;  %v715_v7 = vsub.s32 4294967266, %v710_v53  ;;  %v712_v49 = vshll.u32 %v703_v46, %v710_v53  ;;  %v933_v63 = vadd.f32 %v2385_v45, %v932_v3 }
 0x1b4   :  { %v2361_v19 = vsub.s32 %v1036_v52, %v1039_v16  ;;  %v759_v16 = vmul.f32 %v1631_v21, %v758_v9  ;;  %v2443_v3 = vmul.f32 %v2439_v14, %v2164_v56  ;;  %v1102_v9 = vand.u32 2147483647, %v2396_v25 }
 0x1b5   :  { %v713_v29 = vshrl.u32 %v695_v5, %v711_v6  ;;  %v716_v10 = vadd.s32 127, %v715_v7  ;;  %v728_v6 = vsel %vm2369_vm8, 0, %v726_v59 }
 0x1b6   :  { %vm1041_vm6 = vcmp.lt.s32.totalorder %v2361_v19, 0  ;;  %v1042_v47 = vsub.s32 0, %v2361_v19 }
 0x1b7   :  { %v714_v15 = vor.u32 %v713_v29, %v712_v49  ;;  %v717_v20 = vshll.u32 %v716_v10, 23  ;;  %v595_v29 = vmul.f32 %v1629_v55, %v594_v1  ;;  %v745_v10 = vadd.s32 3, %v728_v6 }
 0x1b8   :  { %v1043_v24 = vsel %vm1041_vm6, %v1042_v47, %v2361_v19 }
 0x1b9   :  { %v718_v17 = vor.u32 4788187, %v717_v20  ;;  %v721_v18 = vcvt.s32.f32 %v714_v15  ;;  %v1044_v32 = vclz %v1043_v24  ;;  %v760_v24 = vadd.f32 %v1631_v21, %v759_v16 }
 0x1bb   :  { %v719_v23 = vand.u32 2147483647, %v718_v17  ;;  %v1555_v34 = vadd.s32 4294967294, %v1044_v32  ;;  %v596_v17 = vadd.f32 %v1629_v55, %v595_v29 }
 0x1bd   :  { %v722_v2 = vmul.f32 %v721_v18, %v719_v23  ;;  %vm1556_vm10 = vcmp.lt.s32.totalorder %v1555_v34, 0  ;;  %v746_v18 = vand.u32 3, %v745_v10  ;;  %v598_v27 = vsel %vm597_vm12, %v1629_v55, %v596_v17 }
 0x1be   :  { %v2387_v39 = vsel %vm1556_vm10, 0, %v1555_v34  ;;  %v765_v34 = vand.u32 2147483647, %v2382_v13  ;;  %v1062_v55 = vsub.s32 4, %v2358_v12  ;;  %vm2433_vm10 = vcmp.le.f32.partialorder %v938_v0, 0.7853982 }
 0x1bf   :  { %v723_v28 = vxor.u32 2147483648, %v722_v2  ;;  %v1052_v43 = vsub.s32 4294967266, %v2387_v39  ;;  %v1048_v51 = vsub.s32 32, %v2387_v39  ;;  %v1049_v5 = vshll.u32 %v2361_v19, %v2387_v39 }
 0x1c0   :  { %v767_v19 = vand.u32 2147483648, %v2382_v13  ;;  %vm747_vm13 = vcmp.lt.s32.totalorder %v746_v18, 2  ;;  %vm748_vm14 = vcmp.eq.s32.totalorder %v746_v18, 0  ;;  %vm751_vm15 = vcmp.eq.s32.totalorder %v746_v18, 2 }
 0x1c1   :  { %v724_v48 = vsel %vm603_vm7, %v723_v28, %v722_v2  ;;  %v1053_v26 = vadd.s32 127, %v1052_v43  ;;  %v1050_v53 = vshrl.u32 %v1032_v42, %v1048_v51  ;;  %v599_v28 = vmul.f32 %v598_v27, %v2184_v8 }
 0x1c2   :  { %v727_v33 = vsel %vm2369_vm8, %v2197_v31, %v724_v48  ;;  %v2413_v48 = vpop.eup %1632  ;;  %v764_v43 = vsel %vm763_vm3, %v1631_v21, %v760_v24  ;;  %vm766_vm4 = vcmp.eq.f32.partialorder %v765_v34, 8.507059e+37  ;;  %vm940_vm8 = vcmp.lt.s32.totalorder %v2193_v22, 0 }
 0x1c3   :  { %v729_v36 = vmul.f32 %v727_v33, %v727_v33  ;;  %v1054_v52 = vshll.u32 %v1053_v26, 23  ;;  %v600_v39 = vsub.f32 0.5, %v599_v28  ;;  %v1094_v21 = vmul.f32 %v2413_v48, %v2396_v25 }
 0x1c4   :  { %v1063_v11 = vsel %vm940_vm8, %v1062_v55, %v2358_v12  ;;  %vm1099_vm12 = vweird.f32 %v2413_v48 }
 0x1c5   :  { %v730_v50 = vmul.f32 -0.001358992, %v729_v36  ;;  %v737_v37 = vmul.f32 -0.00019511016, %v729_v36  ;;  %v1055_v23 = vor.u32 4788187, %v1054_v52 }
 0x1c6   :  { %v1095_v1 = vsub.f32 1.0, %v1094_v21  ;;  %v1852_v52 = vmov 120.0  }
 0x1c7   :  { %v731_v44 = vadd.f32 0.041655596, %v730_v50  ;;  %v738_v46 = vadd.f32 0.008332121, %v737_v37  ;;  %v935_v50 = vsel %vm934_vm11, %v2385_v45, %v933_v63  ;;  %v1051_v37 = vor.u32 %v1050_v53, %v1049_v5 }
 0x1c8   :  { %v1056_v54 = vand.u32 2147483647, %v1055_v23  ;;  %vm1098_vm11 = vweird.f32 %v2396_v25  ;;  %v1065_v5 = vsel %vm2433_vm10, 0, %v1063_v11  ;;  %v1104_v53 = vand.u32 2147483648, %v2396_v25 }
 0x1c9   :  { %v732_v61 = vmul.f32 %v731_v44, %v729_v36  ;;  %v739_v38 = vmul.f32 %v738_v46, %v729_v36  ;;  %v1058_v45 = vcvt.s32.f32 %v1051_v37  ;;  %1634 = vrcp.f32 %v1852_v52 }
 0x1ca   :  { %v1096_v12 = vmul.f32 %v2413_v48, %v1095_v1  ;;  %v1262_v63 = vadd.s32 3, %v1065_v5  ;;  %v2505_v24 = vand.u32 3, %v1065_v5 }
 0x1cb   :  { %v733_v60 = vadd.f32 -0.4999988, %v732_v61  ;;  %v740_v41 = vadd.f32 -0.16666654, %v739_v38  ;;  %v2429_v61 = vmul.f32 %v2425_v4, %v2164_v56  ;;  %v1059_v0 = vmul.f32 %v1058_v45, %v1056_v54 }
 0x1cc   :  { %v1097_v31 = vadd.f32 %v2413_v48, %v1096_v12  ;;  %v2510_v28 = vand.u32 3, %v1262_v63  ;;  %vm1087_vm2 = vcmp.eq.s32.totalorder %v2505_v24, 2 }
 0x1cd   :  { %v734_v7 = vmul.f32 %v733_v60, %v729_v36  ;;  %v741_v49 = vmul.f32 %v740_v41, %v729_v36  ;;  %v919_v36 = vand.u32 3, %v728_v6  ;;  %v2448_v41 = vmul.f32 %v935_v50, %v2184_v8  ;;  %v2458_v6 = vld [vmem:[#allocation10 + $0x10] sm:$0xff] }
 0x1ce   :  { %v1292_v50 = vmul.f32 %v2176_v62, %v2443_v3  ;;  %vm1268_vm3 = vcmp.eq.s32.totalorder %v2510_v28, 2 }
 0x1cf   :  { %v735_v15 = vadd.f32 1.0, %v734_v7  ;;  %v742_v20 = vadd.f32 1.0, %v741_v49  ;;  %vm921_vm5 = vcmp.eq.s32.totalorder %v919_v36, 0  ;;  %vm920_vm6 = vcmp.lt.s32.totalorder %v919_v36, 2 }
 0x1d0   :  { %vm924_vm7 = vcmp.eq.s32.totalorder %v919_v36, 2  ;;  %v2462_v7 = vmul.f32 %v2458_v6, %v2164_v56  ;;  %v1060_v49 = vxor.u32 2147483648, %v1059_v0  ;;  %v937_v10 = vsub.f32 0.5, %v2448_v41 }
 0x1d1   :  { %v743_v47 = vmul.f32 %v742_v20, %v727_v33  ;;  %v752_v2 = vxor.u32 2147483648, %v735_v15  ;;  %v768_v33 = vor.u32 1.1754944e-38, %v767_v19  ;;  %v1105_v19 = vor.u32 1.1754944e-38, %v1104_v53 }
 0x1d2   :  { %v1061_v17 = vsel %vm940_vm8, %v1060_v49, %v1059_v0  ;;  %v1295_v54 = vmul.f32 %v2168_v57, %v2462_v7  ;;  %vm1264_vm8 = vcmp.lt.s32.totalorder %v2510_v28, 2 }
 0x1d3   :  { %v749_v30 = vxor.u32 2147483648, %v743_v47  ;;  %v753_v32 = vsel %vm751_vm15, %v752_v2, %v743_v47  ;;  %v769_v46 = vsel %vm766_vm4, %v768_v33, %v764_v43  ;;  %v926_v26 = vsel %vm924_vm7, %v752_v2, %v743_v47  ;;  %v1635_v2 = vpop.eup %1634 }
 0x1d4   :  { %v2497_v18 = vsel %vm2433_vm10, %v2193_v22, %v1061_v17  ;;  %v1110_v33 = vmul.f32 120.0, %v1635_v2  ;;  %v1294_v43 = vmul.f32 %v2176_v62, %v2429_v61  ;;  %vm1084_vm4 = vcmp.eq.s32.totalorder %v2505_v24, 0 }
 0x1d5   :  { %v750_v35 = vsel %vm748_vm14, %v735_v15, %v749_v30  ;;  %v923_v51 = vsel %vm921_vm5, %v735_v15, %v749_v30  ;;  %v2472_v15 = vmul.f32 %v2396_v25, %v2382_v13  ;;  %v1066_v23 = vmul.f32 %v2497_v18, %v2497_v18 }
 0x1d6   :  { %v754_v40 = vsel %vm747_vm13, %v750_v35, %v753_v32  ;;  %v927_v60 = vsel %vm920_vm6, %v923_v51, %v926_v26  ;;  %vm2490_vm13 = vmor %vm1098_vm11, %vm1099_vm12  ;;  %vm1103_vm14 = vcmp.eq.f32.partialorder %v1102_v9, 8.507059e+37  ;;  %v1291_v30 = vmul.f32 %v2172_v58, %v2462_v7  ;;  %v2565_v9 = vld [vmem:[#allocation9 + $0x18] sm:$0xff] }
 0x1d7   :  { %v755_v44 = vsel %vm744_vm0, nan, %v754_v40  ;;  %v2482_v16 = vsel %vm744_vm0, nan, %v927_v60  ;;  %1636 = vrcp.f32 %v2472_v15  ;;  %v1284_v25 = vand.u32 2147483647, %v2472_v15 }
 0x1d8   :  { %v770_v42 = vmul.f32 %v769_v46, %v755_v44  ;;  %v1286_v47 = vand.u32 2147483648, %v2472_v15  ;;  %v1101_v27 = vsel %vm2490_vm13, %v2413_v48, %v1097_v31  ;;  %v1067_v32 = vmul.f32 -0.001358992, %v1066_v23 }
 0x1d9   :  { %v1074_v34 = vmul.f32 -0.00019511016, %v1066_v23  ;;  %vm1280_vm15 = vweird.f32 %v2472_v15  ;;  %v2515_v35 = vsel %vm1103_vm14, %v1105_v19, %v1101_v27  ;;  %vm1114_vm0 = vweird.f32 %v1635_v2  ;;  %v2568_v19 = vld [vmem:[#allocation9 + $0x20] sm:$0xff] }
 0x1da   :  { %v771_v59 = vsel %vm588_vm9, %v600_v39, %v770_v42  ;;  %v1287_v36 = vor.u32 1.1754944e-38, %v1286_v47  ;;  %v1068_v37 = vadd.f32 0.041655596, %v1067_v32  ;;  %v1111_v48 = vsub.f32 1.0, %v1110_v33  ;;  %v2597_v33 = vld [vmem:[#allocation9 + $0x30] sm:$0xff] }
 0x1db   :  { %v2467_v29 = vmul.f32 %v771_v59, %v2168_v57  ;;  %v2475_v20 = vmul.f32 %v771_v59, %v2172_v58  ;;  %v2478_v56 = vmul.f32 %v771_v59, %v2176_v62  ;;  %v1075_v39 = vadd.f32 0.008332121, %v1074_v34 }
 0x1dc   :  { %vm2519_vm1 = vcmp.eq.f32.partialorder %v1284_v25, 8.507059e+37  ;;  %v2527_v46 = vsub.f32 %v1291_v30, %v1292_v50  ;;  %v1297_v42 = vmul.f32 %v2168_v57, %v2443_v3  ;;  %v1298_v51 = vmul.f32 %v2172_v58, %v2429_v61  ;;  %v2570_v25 = vld [vmem:[#allocation9 + $0x28] sm:$0xff] }
 0x1dd   :  { %v1637_v44 = vpop.eup %1636  ;;  %v1069_v26 = vmul.f32 %v1068_v37, %v1066_v23  ;;  %v1076_v45 = vmul.f32 %v1075_v39, %v1066_v23  ;;  %v1112_v55 = vmul.f32 %v1635_v2, %v1111_v48  ;;  %vm1265_vm5 = vcmp.eq.s32.totalorder %v2510_v28, 0 }
 0x1de   :  { %v1276_v38 = vmul.f32 %v1637_v44, %v2472_v15  ;;  %vm1281_vm6 = vweird.f32 %v1637_v44  ;;  %v2538_v21 = vsub.f32 %v1294_v43, %v1295_v54  ;;  %v2540_v59 = vsub.f32 %v1297_v42, %v1298_v51 }
 0x1df   :  { %v2544_v60 = vmul.f32 %v2527_v46, %v2176_v62  ;;  %v1070_v0 = vadd.f32 -0.4999988, %v1069_v26  ;;  %v1077_v11 = vadd.f32 -0.16666654, %v1076_v45  ;;  %vm1083_vm7 = vcmp.lt.s32.totalorder %v2505_v24, 2  ;;  %vm2578_vm11 = vmor %vm1280_vm15, %vm1281_vm6 }
 0x1e0   :  { %v1113_v1 = vadd.f32 %v1635_v2, %v1112_v55  ;;  %v1277_v5 = vsub.f32 1.0, %v1276_v38  ;;  %vm1081_vm10 = vweird.f32 %v2193_v22  ;;  %v2551_v53 = vmul.f32 %v2540_v59, %v2172_v58 }
 0x1e1   :  { %v2555_v52 = vmul.f32 %v2538_v21, %v2176_v62  ;;  %v2559_v49 = vmul.f32 %v2540_v59, %v2168_v57  ;;  %v2563_v12 = vmul.f32 %v2538_v21, %v2168_v57  ;;  %v1071_v63 = vmul.f32 %v1070_v0, %v1066_v23 }
 0x1e2   :  { %v1078_v17 = vmul.f32 %v1077_v11, %v1066_v23  ;;  %v1115_v13 = vsel %vm1114_vm0, %v1635_v2, %v1113_v1  ;;  %v1278_v31 = vmul.f32 %v1637_v44, %v1277_v5  ;;  %v2588_v2 = vmul.f32 %v2527_v46, %v2172_v58 }
 0x1e3   :  { %v2573_v62 = vmul.f32 %v1115_v13, %v2184_v8  ;;  %v1302_v23 = vsub.f32 %v2551_v53, %v2555_v52  ;;  %v1305_v47 = vsub.f32 %v2544_v60, %v2559_v49  ;;  %v1072_v27 = vadd.f32 1.0, %v1071_v63 }
 0x1e4   :  { %v1079_v8 = vadd.f32 1.0, %v1078_v17  ;;  %v1279_v30 = vadd.f32 %v1637_v44, %v1278_v31  ;;  %v2592_v15 = vmul.f32 %v2565_v9, %v2565_v9  ;;  %v1308_v34 = vsub.f32 %v2563_v12, %v2588_v2 }
 0x1e5   :  { %v1117_v32 = vsub.f32 0.16666667, %v2573_v62  ;;  %v2601_v50 = vmul.f32 %v2568_v19, %v2568_v19  ;;  %v1327_v58 = vmul.f32 %v2570_v25, %v2570_v25  ;;  %v1088_v39 = vxor.u32 2147483648, %v1072_v27 }
 0x1e6   :  { %v1080_v37 = vmul.f32 %v1079_v8, %v2497_v18  ;;  %v1283_v48 = vsel %vm2578_vm11, %v1637_v44, %v1279_v30  ;;  %v1328_v43 = vmul.f32 %v2568_v19, %v2565_v9  ;;  %v2614_v42 = vmul.f32 %v2570_v25, %v2565_v9 }
 0x1e7   :  { %v1288_v54 = vsel %vm2519_vm1, %v1287_v36, %v1283_v48  ;;  %v2618_v51 = vmul.f32 %v2570_v25, %v2568_v19  ;;  %v2622_v18 = vmul.f32 %v2597_v33, %v2565_v9  ;;  %v1332_v36 = vmul.f32 %v2597_v33, %v2568_v19 }
 0x1e8   :  { %v1085_v26 = vxor.u32 2147483648, %v1080_v37  ;;  %v1089_v44 = vsel %vm1087_vm2, %v1088_v39, %v1080_v37  ;;  %v1270_v40 = vsel %vm1268_vm3, %v1088_v39, %v1080_v37  ;;  %v1333_v45 = vmul.f32 %v2597_v33, %v2570_v25 }
 0x1e9   :  { %v1334_v55 = vadd.f32 %v1327_v58, %v2601_v50  ;;  %v1343_v38 = vadd.f32 %v1327_v58, %v2592_v15  ;;  %v1346_v0 = vsub.f32 %v2618_v51, %v2622_v18  ;;  %v1339_v5 = vadd.f32 %v1332_v36, %v2614_v42 }
 0x1ea   :  { %v1086_v11 = vsel %vm1084_vm4, %v1072_v27, %v1085_v26  ;;  %v1267_v1 = vsel %vm1265_vm5, %v1072_v27, %v1085_v26  ;;  %v1348_v63 = vsub.f32 %v2614_v42, %v1332_v36  ;;  %v1337_v62 = vsub.f32 %v1328_v43, %v1333_v45 }
 0x1eb   :  { %v1090_v17 = vsel %vm1083_vm7, %v1086_v11, %v1089_v44  ;;  %v1271_v13 = vsel %vm1264_vm8, %v1267_v1, %v1270_v40  ;;  %v2646_v31 = vmul.f32 2.0, %v1334_v55  ;;  %v2652_v27 = vmul.f32 2.0, %v1339_v5  ;;  %v1641_v5 = vld [vmem:[#allocation10 + $0x18] sm:$0xff] }
 0x1ec   :  { %v1091_v57 = vsel %vm1081_vm10, nan, %v1090_v17  ;;  %v1272_v8 = vsel %vm1081_vm10, nan, %v1271_v13  ;;  %v1341_v30 = vadd.f32 %v1333_v45, %v1328_v43  ;;  %v2656_v28 = vmul.f32 2.0, %v1337_v62  ;;  %v1642_v13 = vld [vmem:[#allocation10 + $0x20] sm:$0xff] }
 0x1ed   :  { %v1092_v37 = vsub.f32 1.0, %v1091_v57  ;;  %v1273_v24 = vsub.f32 %v2193_v22, %v1272_v8  ;;  %v1336_v39 = vsub.f32 1.0, %v2646_v31  ;;  %v1643_v57 = vld [vmem:[#allocation10 + $0x28] sm:$0xff]  ;;  %v1349_v53 = vmul.f32 2.0, %v1348_v63 }
 0x1ee   :  { %v1350_v12 = vadd.f32 %v2622_v18, %v2618_v51  ;;  %v1384_v2 = vmul.f32 %v2565_v9, %v2482_v16  ;;  %v1364_v51 = vld [vmem:[#allocation9 + $0x8] sm:$0xff]  ;;  %v1388_v31 = vmul.f32 %v2570_v25, %v2475_v20 }
 0x1ef   :  { %v1107_v55 = vmul.f32 %v2515_v35, %v1092_v37  ;;  %v1289_v11 = vmul.f32 %v1288_v54, %v1273_v24 }
 0x1f1   :  { %v1290_v35 = vsel %vm588_vm9, %v1117_v32, %v1289_v11  ;;  %v1342_v32 = vmul.f32 2.0, %v1341_v30  ;;  %v1374_v30 = vld [vmem:[#allocation9 + $0x10] sm:$0xff] }
 0x1f2   :  { %v1315_v22 = vmul.f32 %v1305_v47, %v1290_v35 }
 0x209   :  { %v553_v58 = vpop.f32.mrf.mxu1 }
 0x20a   :  { %v1420_v48 = vperm.slane %v553_v58, 0  ;;  %v1424_v42 = vperm.slane %v553_v58, 1  ;;  %v1429_v26 = vperm.slane %v553_v58, 2  ;;  %v1434_v44 = vperm.slane %v553_v58, 3  ;;  %556 = vst [vmem:[#allocation16] sm:$0x3f] %v553_v58 }
 0x20b   :  { %v1439_v40 = vperm.slane %v553_v58, 4  ;;  %v1444_v36 = vperm.slane %v553_v58, 5  ;;  %v1108_v58 = vsel %vm588_vm9, %v937_v10, %v1107_v55  ;;  %v1319_v10 = vmul.f32 %v1308_v34, %v1290_v35 }
 0x20c   :  { %v1421_v43 = vadd.f32 %v2425_v4, %v1420_v48  ;;  %v1425_v45 = vadd.f32 %v2439_v14, %v1424_v42  ;;  %v1430_v1 = vadd.f32 %v2458_v6, %v1429_v26  ;;  %v1435_v17 = vadd.f32 %v1641_v5, %v1434_v44 }
 0x20d   :  { %v1440_v62 = vadd.f32 %v1642_v13, %v1439_v40  ;;  %v1445_v8 = vadd.f32 %v1643_v57, %v1444_v36  ;;  %v1309_v4 = vmul.f32 %v2527_v46, %v1108_v58  ;;  %v1311_v14 = vmul.f32 %v1302_v23, %v1290_v35 }
 0x20e   :  { %1422 = vst [vmem:[#allocation14] sm:$0xff] %v1421_v43  ;;  %v1313_v41 = vmul.f32 %v2538_v21, %v1108_v58  ;;  %v1317_v6 = vmul.f32 %v2540_v59, %v1108_v58  ;;  %v1344_v46 = vmul.f32 2.0, %v1343_v38  ;;  %v1347_v59 = vmul.f32 2.0, %v1346_v0  ;;  %v1355_v38 = vld [vmem:[#allocation9] sm:$0xff] }
 0x20f   :  { %1427 = vst [vmem:[#allocation14 + $0x8] sm:$0xff] %v1425_v45  ;;  %v1310_v21 = vadd.f32 %v1309_v4, %v2429_v61  ;;  %v1352_v23 = vadd.f32 %v2601_v50, %v2592_v15  ;;  %v1351_v34 = vmul.f32 2.0, %v1350_v12  ;;  %v1386_v15 = vmul.f32 %v2568_v19, %v2478_v56 }
 0x210   :  { %1432 = vst [vmem:[#allocation14 + $0x10] sm:$0xff] %v1430_v1  ;;  %v1314_v60 = vadd.f32 %v1313_v41, %v2443_v3  ;;  %v1318_v52 = vadd.f32 %v1317_v6, %v2462_v7  ;;  %v1345_v49 = vsub.f32 1.0, %v1344_v46  ;;  %v1383_v3 = vmul.f32 %v2597_v33, %v2467_v29 }
 0x211   :  { %1437 = vst [vmem:[#allocation14 + $0x18] sm:$0xff] %v1435_v17  ;;  %v1312_v47 = vadd.f32 %v1311_v14, %v1310_v21  ;;  %v1353_v54 = vmul.f32 2.0, %v1352_v23  ;;  %v1395_v5 = vmul.f32 %v2568_v19, %v2482_v16  ;;  %v1401_v17 = vmul.f32 %v2597_v33, %v2478_v56 }
 0x212   :  { %1442 = vst [vmem:[#allocation14 + $0x20] sm:$0xff] %v1440_v62  ;;  %v1316_v61 = vadd.f32 %v1315_v22, %v1314_v60  ;;  %v1320_v7 = vadd.f32 %v1319_v10, %v1318_v52  ;;  %v1385_v36 = vadd.f32 %v1384_v2, %v1383_v3  ;;  %v1402_v4 = vmul.f32 %v2565_v9, %v2475_v20 }
 0x213   :  { %1447 = vst [vmem:[#allocation14 + $0x28] sm:$0xff] %v1445_v8  ;;  %v1356_v50 = vmul.f32 %v1336_v39, %v1312_v47  ;;  %v1365_v0 = vmul.f32 %v1342_v32, %v1312_v47  ;;  %v1354_v37 = vsub.f32 1.0, %v1353_v54  ;;  %v1375_v42 = vmul.f32 %v1349_v53, %v1312_v47 }
 0x214   :  { %1473 = dma.vmem_to_hbm [thread:$0]  %s1466_s19, 768, %s1468_s11, [#allocation15], %s1837_s29, %s1837_s29, %s1838_s30   ;;  %v1358_v18 = vmul.f32 %v2656_v28, %v1316_v61  ;;  %v1367_v63 = vmul.f32 %v1345_v49, %v1316_v61  ;;  %v1360_v24 = vmul.f32 %v2652_v27, %v1320_v7  ;;  %v1369_v48 = vmul.f32 %v1347_v59, %v1320_v7 }
 0x215   :  { %1484 = dma.vmem_to_hbm [thread:$0]  %s1480_s22, 128, %s1482_s4, [#allocation15]   ;;  %v1357_v26 = vadd.f32 %v1356_v50, %v1355_v38  ;;  %v1366_v44 = vadd.f32 %v1365_v0, %v1364_v51  ;;  %v1377_v40 = vmul.f32 %v1351_v34, %v1316_v61  ;;  %v1376_v55 = vadd.f32 %v1375_v42, %v1374_v30 }
 0x216   :  { %v1379_v11 = vmul.f32 %v1354_v37, %v1320_v7  ;;  %v1392_v39 = vmul.f32 %v2597_v33, %v2475_v20  ;;  %v1387_v45 = vadd.f32 %v1386_v15, %v1385_v36  ;;  %v1393_v27 = vmul.f32 %v2565_v9, %v2478_v56 }
 0x217   :  { %v1359_v28 = vadd.f32 %v1358_v18, %v1357_v26  ;;  %v1368_v43 = vadd.f32 %v1367_v63, %v1366_v44  ;;  %v1378_v1 = vadd.f32 %v1377_v40, %v1376_v55  ;;  %v1397_v8 = vmul.f32 %v2570_v25, %v2467_v29 }
 0x218   :  { %v1394_v57 = vsub.f32 %v1392_v39, %v1393_v27  ;;  %v1389_v35 = vsub.f32 %v1387_v45, %v1388_v31  ;;  %v1404_v14 = vmul.f32 %v2568_v19, %v2467_v29  ;;  %v1410_v22 = vmul.f32 %v2597_v33, %v2482_v16 }
 0x219   :  { %v1361_v13 = vadd.f32 %v1360_v24, %v1359_v28  ;;  %v1370_v62 = vadd.f32 %v1369_v48, %v1368_v43  ;;  %v1380_v58 = vadd.f32 %v1379_v11, %v1378_v1  ;;  %v1411_v6 = vmul.f32 %v2565_v9, %v2467_v29 }
 0x21a   :  { %v1396_v41 = vadd.f32 %v1395_v5, %v1394_v57  ;;  %v1413_v10 = vmul.f32 %v2568_v19, %v2475_v20  ;;  %v1403_v32 = vadd.f32 %v1402_v4, %v1401_v17  ;;  %v1406_v46 = vmul.f32 %v2570_v25, %v2482_v16  ;;  %1391 = vst [vmem:[#allocation13 + $0x18] sm:$0xff] %v1389_v35 }
 0x21b   :  { %1362 = vst [vmem:[#allocation13] sm:$0xff] %v1361_v13  ;;  %v1412_v60 = vsub.f32 %v1410_v22, %v1411_v6  ;;  %v1415_v59 = vmul.f32 %v2570_v25, %v2478_v56 }
 0x21c   :  { %1372 = vst [vmem:[#allocation13 + $0x8] sm:$0xff] %v1370_v62  ;;  %v1398_v21 = vadd.f32 %v1397_v8, %v1396_v41  ;;  %v1405_v53 = vsub.f32 %v1403_v32, %v1404_v14 }
 0x21d   :  { %1382 = vst [vmem:[#allocation13 + $0x10] sm:$0xff] %v1380_v58  ;;  %v1414_v29 = vsub.f32 %v1412_v60, %v1413_v10 }
 0x21e   :  { %1400 = vst [vmem:[#allocation13 + $0x20] sm:$0xff] %v1398_v21  ;;  %v1407_v20 = vadd.f32 %v1406_v46, %v1405_v53 }
 0x21f   :  { %v1416_v9 = vsub.f32 %v1414_v29, %v1415_v59 }
 0x220   :  { %1409 = vst [vmem:[#allocation13 + $0x28] sm:$0xff] %v1407_v20 }
 0x221   :  { %1418 = vst [vmem:[#allocation13 + $0x30] sm:$0xff] %v1416_v9 }
 0x222   :  { %1460 = dma.vmem_to_hbm [thread:$0]  %s1453_s23, 896, %s1455_s25, [#allocation7], %s1837_s29, %s1837_s29, %s1838_s30  }
 0x223   :  { %1830 = dma.done.wait [#allocation7], 896  }
 0x224   :  { %1831 = vsyncadd [#allocation7], 4294966400 }
 0x225   :  { %1832 = dma.done.wait [#allocation15], 896  }
 0x226   :  { %1833 = vsyncadd [#allocation15], 4294966400 }
 0x227   :  { %1834 = dma.done.wait [#allocation18], 128  }
 0x228   :  { %1835 = vsyncadd [#allocation18], 4294967168 }
 0x229   :  { %1512 = vsyncpa [#allocation6], 1 }
 0x22a   :  { %1513 = vsyncpa [#allocation11], 1 }
 0x22b   :  { %1514 = vsyncpa [#allocation7], 1 }
 0x22c   :  { %1515 = vsyncpa [#allocation15], 1 }
 0x22d   :  { %1516 = vsyncpa [#allocation18], 1 }
 0x22e   :  { %1517 = vsyncpa [#allocation8], 1 }

</bundles_post_ra>
